<compile_context>
chip_gen: v5e
topology: v5e:2x2
jax: 0.10.0
libtpu: 0.0.40
codegen_flags: <defaults>
</compile_context>

<pallas_src>
import functools

import jax
import jax.numpy as jnp
from jax import lax
from jax.experimental import pallas as pl
from jax.experimental.pallas import tpu as pltpu


def _wavecorr_kernel(x_ref, wbig_ref, bvec_ref, o_ref, xcol_ref, *,
                     batch_block, k_taps, w_out):
    """Fused WaveCorr_Box forward for a block of `batch_block` batch elements.

    x_ref    : (Bt, H, W)        single-channel input rows (lane axis = W)
    wbig_ref : (OC*H, K*H)       folded weights (dilated_conv1 + conv_box + corr)
    bvec_ref : (OC*H, 1)         folded biases
    o_ref    : (Bt, OC*H, Wout)  relu(corr + xx), flattened over (channel, row)
    xcol_ref : (K*H, Wout)       VMEM scratch holding the im2col slab
    """
    h = x_ref.shape[1]
    wbig = wbig_ref[...]
    bvec = bvec_ref[...]
    for t in range(batch_block):                       # static unroll over the block
        x = x_ref[t]                                   # (H, W)
        # Build im2col in VMEM scratch: xcol[j*H + h', w] = x[h', w + j]
        for j in range(k_taps):                        # static unroll over conv taps
            xcol_ref[j * h:(j + 1) * h, :] = x[:, j:j + w_out]
        # Single MXU matmul computes all 21 output channels at once.
        acc = jnp.dot(wbig, xcol_ref[...],
                      preferred_element_type=jnp.float32)      # (OC*H, Wout)
        o_ref[t] = jnp.maximum(acc + bvec, 0.0).astype(o_ref.dtype)


def _fold_params(wd, bd, wb, bb, wc, bc):
    """Fold dilated_conv1 / conv_box / conv_corr into one matmul (done once).

    wd: (C, K)   dilated_conv1 weight[:, 0, 0, :],   bd: (C,)
    wb: (C+1, K) conv_box weight[:, 0, 0, :],        bb: (C+1,)
    wc: (C, H+1) conv_corr weight[0, :, :, 0],       bc: (1,)
    Returns Wbig ((C+1)*H, K*H) and bvec ((C+1)*H, 1).
    """
    C, K = wd.shape
    H = wc.shape[1] - 1
    dt = wd.dtype
    bc = bc.reshape(())

    w0 = wc[:, 0]                                    # (C,)  -> row 0 of the (21,1) kernel
    w1 = wc[:, 1:]                                   # (C,H) -> rows 1..20
    eye_h = jnp.eye(H, dtype=dt)

    # Output channels 0..C-1:  out = (Wd + Wb) conv x   (y + xx share the im2col)
    wsum = wd + wb[:C]                                               # (C, K)
    top = (wsum[:, None, :, None] * eye_h[None, :, None, :]).reshape(C * H, K * H)

    # Output channel C (= stacked corr channel + xx channel 20):
    #   A[j]     = sum_c w0[c] Wd[c,j]          (row-dependent corr term)
    #   B2[j,h'] = sum_c w1[c,h'] Wd[c,j]       (row-independent corr term)
    a = w0 @ wd                                                      # (K,)
    b2 = wd.T @ w1                                                   # (K, H)
    last = ((a + wb[C])[None, :, None] * eye_h[:, None, :]
            + b2[None, :, :]).reshape(H, K * H)
    wbig = jnp.concatenate([top, last], axis=0)                      # (OC*H, K*H)

    bias_top = jnp.repeat(bd + bb[:C], H)                            # (C*H,)
    c20 = bc + jnp.dot(w0, bd) + jnp.dot(jnp.sum(w1, axis=1), bd) + bb[C]
    bias_last = c20 * jnp.ones((H,), dtype=dt)
    bvec = jnp.concatenate([bias_top, bias_last])[:, None]           # (OC*H, 1)
    return wbig, bvec


def wavecorr_box_forward(x, conv_d_w, conv_d_b, conv_b_w, conv_b_b,
                         conv_c_w, conv_c_b, *, batch_block=1):
    """WaveCorr_Box(i=1) forward: returns (relu(corrLayer(conv1(x)) + conv_box(x)), x).

    x: (B, 1, 20, W) f32;  conv_d_w: (20,1,1,K);  conv_b_w: (21,1,1,K);
    conv_c_w: (1,20,21,1);  biases conv_d_b (20,), conv_b_b (21,), conv_c_b (1,).
    """
    # TODO(synk): torch.nn.Dropout(p=0.5) is identity in eval mode; training-mode
    # stochastic masking (pltpu.prng_*) is not implemented here.
    B, Cin, H, W = x.shape
    C = conv_d_w.shape[0]              # 20
    OC = conv_b_w.shape[0]             # 21
    K = conv_d_w.shape[3]              # 17 for the i=1 box
    Wout = W - K + 1
    assert Cin == 1, "this kernel specializes WaveCorr_Box(i=1): 1 input channel"
    assert C == 20 and OC == C + 1 and H == 20, "Corr_Layer requires 20 features"
    assert Wout >= 1 and B % batch_block == 0

    wd = conv_d_w[:, 0, 0, :]          # (C, K)
    wb = conv_b_w[:, 0, 0, :]          # (OC, K)
    wc = conv_c_w[0, :, :, 0]          # (C, H+1)
    wbig, bvec = _fold_params(wd, conv_d_b, wb, conv_b_b, wc, conv_c_b)

    x_rows = x[:, 0]                   # (B, H, W): drop the channel dim (free)
    Bt = batch_block

    kernel = functools.partial(_wavecorr_kernel, batch_block=Bt,
                               k_taps=K, w_out=Wout)
    out_flat = pl.pallas_call(
        kernel,
        out_shape=jax.ShapeDtypeStruct((B, OC * H, Wout), x.dtype),
        grid=(B // Bt,),
        in_specs=[
            pl.BlockSpec((Bt, H, W), lambda g: (g, 0, 0)),
            pl.BlockSpec((OC * H, K * H), lambda g: (0, 0)),
            pl.BlockSpec((OC * H, 1), lambda g: (0, 0)),
        ],
        out_specs=pl.BlockSpec((Bt, OC * H, Wout), lambda g: (g, 0, 0)),
        scratch_shapes=[pltpu.VMEM((K * H, Wout), jnp.float32)],
        compiler_params=pltpu.CompilerParams(
            dimension_semantics=("parallel",)),
    )(x_rows, wbig, bvec)

    # (B, OC*H, Wout) -> (B, OC, H, Wout) is a contiguous (free) reshape.
    out = out_flat.reshape(B, OC, H, Wout)
    return out, x


def ref_forward(x, conv_d_w, conv_d_b, conv_b_w, conv_b_b, conv_c_w, conv_c_b):
    """Pure-JAX mirror of WaveCorr_Box.forward (eval mode: dropout = identity)."""
    dn = ("NCHW", "OIHW", "NCHW")
    y = lax.conv_general_dilated(x, conv_d_w, (1, 1), "VALID",
                                 dimension_numbers=dn)
    y = y + conv_d_b.reshape(1, -1, 1, 1)
    # dropout(p=0.5): identity in eval mode
    H = y.shape[2]
    rows = []
    for iii in range(H):                               # Corr_Layer loop, as in torch
        xx_c = jnp.concatenate([y[:, :, iii:iii + 1, :], y], axis=2)
        r = lax.conv_general_dilated(xx_c, conv_c_w, (1, 1), "VALID",
                                     dimension_numbers=dn)
        rows.append(r + conv_c_b.reshape(1, 1, 1, 1))
    stacked = jnp.concatenate(rows, axis=2)            # (B, 1, H, Wout)
    corr = jnp.concatenate([y, stacked], axis=1)       # (B, 21, H, Wout)
    xx = lax.conv_general_dilated(x, conv_b_w, (1, 1), "VALID",
                                  dimension_numbers=dn)
    xx = xx + conv_b_b.reshape(1, -1, 1, 1)
    out = jnp.maximum(corr + xx, 0.0)
    return out, x


if __name__ == "__main__":
    key = jax.random.PRNGKey(0)
    kx, k1, k2, k3, k4, k5, k6 = jax.random.split(key, 7)

    box_i = 1
    C, H = 20, 20
    K = int(32 / (2 ** box_i * 1) + 1)        # 17 for the i=1 box
    B, W = 2, 48                              # Wout = 32

    x = jax.random.normal(kx, (B, 1, H, W), dtype=jnp.float32)
    conv_d_w = 0.1 * jax.random.normal(k1, (C, 1, 1, K), dtype=jnp.float32)
    conv_d_b = 0.1 * jax.random.normal(k2, (C,), dtype=jnp.float32)
    conv_b_w = 0.1 * jax.random.normal(k3, (C + 1, 1, 1, K), dtype=jnp.float32)
    conv_b_b = 0.1 * jax.random.normal(k4, (C + 1,), dtype=jnp.float32)
    conv_c_w = 0.1 * jax.random.normal(k5, (1, C, H + 1, 1), dtype=jnp.float32)
    conv_c_b = 0.1 * jax.random.normal(k6, (1,), dtype=jnp.float32)

    out, x_short = wavecorr_box_forward(x, conv_d_w, conv_d_b, conv_b_w,
                                        conv_b_b, conv_c_w, conv_c_b,
                                        batch_block=1)
    out = jax.block_until_ready(out)

    ref_out, ref_short = ref_forward(x, conv_d_w, conv_d_b, conv_b_w,
                                     conv_b_b, conv_c_w, conv_c_b)
    assert out.shape == (B, C + 1, H, W - K + 1), out.shape
    assert jnp.allclose(out, ref_out, atol=2e-4, rtol=2e-4), \
        float(jnp.max(jnp.abs(out - ref_out)))
    assert jnp.array_equal(x_short, ref_short)
    print("KERNEL_OK")
</pallas_src>

<mosaic_0001>
module attributes {stable_mosaic.version = 11 : i64} {
  func.func @_wavecorr_kernel(%arg0: i32, %arg1: memref<1x20x48xf32, #tpu.memory_space<vmem>>, %arg2: memref<420x340xf32, #tpu.memory_space<vmem>>, %arg3: memref<420x1xf32, #tpu.memory_space<vmem>>, %arg4: memref<1x420x32xf32, #tpu.memory_space<vmem>>, %arg5: memref<340x32xf32, #tpu.memory_space<vmem>>) attributes {dimension_semantics = [#tpu.dimension_semantics<parallel>], iteration_bounds = array<i64: 2>, scalar_prefetch = 0 : i64, scratch_operands = 1 : i64, tpu.core_type = #tpu.core_type<tc>, window_params = [{transform_indices = @transform_0, window_bounds = array<i64: 1, 20, 48>}, {pipeline_mode = #tpu.pipeline_mode<synchronous>, transform_indices = @transform_1, window_bounds = array<i64: 420, 340>}, {pipeline_mode = #tpu.pipeline_mode<synchronous>, transform_indices = @transform_2, window_bounds = array<i64: 420, 1>}, {transform_indices = @transform_3, window_bounds = array<i64: 1, 420, 32>}]} {
    %c0 = arith.constant 0 : index
    %c0_0 = arith.constant 0 : index
    %0 = vector.load %arg2[%c0, %c0_0] : memref<420x340xf32, #tpu.memory_space<vmem>>, vector<420x340xf32>
    %c0_1 = arith.constant 0 : index
    %c0_2 = arith.constant 0 : index
    %1 = vector.load %arg3[%c0_1, %c0_2] : memref<420x1xf32, #tpu.memory_space<vmem>>, vector<420x1xf32>
    %c0_3 = arith.constant 0 : index
    %c0_4 = arith.constant 0 : index
    %c0_5 = arith.constant 0 : index
    %2 = vector.load %arg1[%c0_3, %c0_4, %c0_5] : memref<1x20x48xf32, #tpu.memory_space<vmem>>, vector<1x20x48xf32>
    %3 = vector.shape_cast %2 : vector<1x20x48xf32> to vector<20x48xf32>
    %4 = vector.extract_strided_slice %3 {offsets = [0, 0], sizes = [20, 32], strides = [1, 1]} : vector<20x48xf32> to vector<20x32xf32>
    %c0_6 = arith.constant 0 : index
    %c0_7 = arith.constant 0 : index
    %5 = vector.load %arg5[%c0_6, %c0_7] : memref<340x32xf32, #tpu.memory_space<vmem>>, vector<20x32xf32>
    tpu.vector_store %arg5[%c0_6, %c0_7], %4 {strides = array<i32>} : memref<340x32xf32, #tpu.memory_space<vmem>>, vector<20x32xf32>,
    %6 = vector.extract_strided_slice %3 {offsets = [0, 1], sizes = [20, 32], strides = [1, 1]} : vector<20x48xf32> to vector<20x32xf32>
    %c20 = arith.constant 20 : index
    %c0_8 = arith.constant 0 : index
    %7 = vector.load %arg5[%c20, %c0_8] : memref<340x32xf32, #tpu.memory_space<vmem>>, vector<20x32xf32>
    tpu.vector_store %arg5[%c20, %c0_8], %6 {strides = array<i32>} : memref<340x32xf32, #tpu.memory_space<vmem>>, vector<20x32xf32>,
    %8 = vector.extract_strided_slice %3 {offsets = [0, 2], sizes = [20, 32], strides = [1, 1]} : vector<20x48xf32> to vector<20x32xf32>
    %c40 = arith.constant 40 : index
    %c0_9 = arith.constant 0 : index
    %9 = vector.load %arg5[%c40, %c0_9] : memref<340x32xf32, #tpu.memory_space<vmem>>, vector<20x32xf32>
    tpu.vector_store %arg5[%c40, %c0_9], %8 {strides = array<i32>} : memref<340x32xf32, #tpu.memory_space<vmem>>, vector<20x32xf32>,
    %10 = vector.extract_strided_slice %3 {offsets = [0, 3], sizes = [20, 32], strides = [1, 1]} : vector<20x48xf32> to vector<20x32xf32>
    %c60 = arith.constant 60 : index
    %c0_10 = arith.constant 0 : index
    %11 = vector.load %arg5[%c60, %c0_10] : memref<340x32xf32, #tpu.memory_space<vmem>>, vector<20x32xf32>
    tpu.vector_store %arg5[%c60, %c0_10], %10 {strides = array<i32>} : memref<340x32xf32, #tpu.memory_space<vmem>>, vector<20x32xf32>,
    %12 = vector.extract_strided_slice %3 {offsets = [0, 4], sizes = [20, 32], strides = [1, 1]} : vector<20x48xf32> to vector<20x32xf32>
    %c80 = arith.constant 80 : index
    %c0_11 = arith.constant 0 : index
    %13 = vector.load %arg5[%c80, %c0_11] : memref<340x32xf32, #tpu.memory_space<vmem>>, vector<20x32xf32>
    tpu.vector_store %arg5[%c80, %c0_11], %12 {strides = array<i32>} : memref<340x32xf32, #tpu.memory_space<vmem>>, vector<20x32xf32>,
    %14 = vector.extract_strided_slice %3 {offsets = [0, 5], sizes = [20, 32], strides = [1, 1]} : vector<20x48xf32> to vector<20x32xf32>
    %c100 = arith.constant 100 : index
    %c0_12 = arith.constant 0 : index
    %15 = vector.load %arg5[%c100, %c0_12] : memref<340x32xf32, #tpu.memory_space<vmem>>, vector<20x32xf32>
    tpu.vector_store %arg5[%c100, %c0_12], %14 {strides = array<i32>} : memref<340x32xf32, #tpu.memory_space<vmem>>, vector<20x32xf32>,
    %16 = vector.extract_strided_slice %3 {offsets = [0, 6], sizes = [20, 32], strides = [1, 1]} : vector<20x48xf32> to vector<20x32xf32>
    %c120 = arith.constant 120 : index
    %c0_13 = arith.constant 0 : index
    %17 = vector.load %arg5[%c120, %c0_13] : memref<340x32xf32, #tpu.memory_space<vmem>>, vector<20x32xf32>
    tpu.vector_store %arg5[%c120, %c0_13], %16 {strides = array<i32>} : memref<340x32xf32, #tpu.memory_space<vmem>>, vector<20x32xf32>,
    %18 = vector.extract_strided_slice %3 {offsets = [0, 7], sizes = [20, 32], strides = [1, 1]} : vector<20x48xf32> to vector<20x32xf32>
    %c140 = arith.constant 140 : index
    %c0_14 = arith.constant 0 : index
    %19 = vector.load %arg5[%c140, %c0_14] : memref<340x32xf32, #tpu.memory_space<vmem>>, vector<20x32xf32>
    tpu.vector_store %arg5[%c140, %c0_14], %18 {strides = array<i32>} : memref<340x32xf32, #tpu.memory_space<vmem>>, vector<20x32xf32>,
    %20 = vector.extract_strided_slice %3 {offsets = [0, 8], sizes = [20, 32], strides = [1, 1]} : vector<20x48xf32> to vector<20x32xf32>
    %c160 = arith.constant 160 : index
    %c0_15 = arith.constant 0 : index
    %21 = vector.load %arg5[%c160, %c0_15] : memref<340x32xf32, #tpu.memory_space<vmem>>, vector<20x32xf32>
    tpu.vector_store %arg5[%c160, %c0_15], %20 {strides = array<i32>} : memref<340x32xf32, #tpu.memory_space<vmem>>, vector<20x32xf32>,
    %22 = vector.extract_strided_slice %3 {offsets = [0, 9], sizes = [20, 32], strides = [1, 1]} : vector<20x48xf32> to vector<20x32xf32>
    %c180 = arith.constant 180 : index
    %c0_16 = arith.constant 0 : index
    %23 = vector.load %arg5[%c180, %c0_16] : memref<340x32xf32, #tpu.memory_space<vmem>>, vector<20x32xf32>
    tpu.vector_store %arg5[%c180, %c0_16], %22 {strides = array<i32>} : memref<340x32xf32, #tpu.memory_space<vmem>>, vector<20x32xf32>,
    %24 = vector.extract_strided_slice %3 {offsets = [0, 10], sizes = [20, 32], strides = [1, 1]} : vector<20x48xf32> to vector<20x32xf32>
    %c200 = arith.constant 200 : index
    %c0_17 = arith.constant 0 : index
    %25 = vector.load %arg5[%c200, %c0_17] : memref<340x32xf32, #tpu.memory_space<vmem>>, vector<20x32xf32>
    tpu.vector_store %arg5[%c200, %c0_17], %24 {strides = array<i32>} : memref<340x32xf32, #tpu.memory_space<vmem>>, vector<20x32xf32>,
    %26 = vector.extract_strided_slice %3 {offsets = [0, 11], sizes = [20, 32], strides = [1, 1]} : vector<20x48xf32> to vector<20x32xf32>
    %c220 = arith.constant 220 : index
    %c0_18 = arith.constant 0 : index
    %27 = vector.load %arg5[%c220, %c0_18] : memref<340x32xf32, #tpu.memory_space<vmem>>, vector<20x32xf32>
    tpu.vector_store %arg5[%c220, %c0_18], %26 {strides = array<i32>} : memref<340x32xf32, #tpu.memory_space<vmem>>, vector<20x32xf32>,
    %28 = vector.extract_strided_slice %3 {offsets = [0, 12], sizes = [20, 32], strides = [1, 1]} : vector<20x48xf32> to vector<20x32xf32>
    %c240 = arith.constant 240 : index
    %c0_19 = arith.constant 0 : index
    %29 = vector.load %arg5[%c240, %c0_19] : memref<340x32xf32, #tpu.memory_space<vmem>>, vector<20x32xf32>
    tpu.vector_store %arg5[%c240, %c0_19], %28 {strides = array<i32>} : memref<340x32xf32, #tpu.memory_space<vmem>>, vector<20x32xf32>,
    %30 = vector.extract_strided_slice %3 {offsets = [0, 13], sizes = [20, 32], strides = [1, 1]} : vector<20x48xf32> to vector<20x32xf32>
    %c260 = arith.constant 260 : index
    %c0_20 = arith.constant 0 : index
    %31 = vector.load %arg5[%c260, %c0_20] : memref<340x32xf32, #tpu.memory_space<vmem>>, vector<20x32xf32>
    tpu.vector_store %arg5[%c260, %c0_20], %30 {strides = array<i32>} : memref<340x32xf32, #tpu.memory_space<vmem>>, vector<20x32xf32>,
    %32 = vector.extract_strided_slice %3 {offsets = [0, 14], sizes = [20, 32], strides = [1, 1]} : vector<20x48xf32> to vector<20x32xf32>
    %c280 = arith.constant 280 : index
    %c0_21 = arith.constant 0 : index
    %33 = vector.load %arg5[%c280, %c0_21] : memref<340x32xf32, #tpu.memory_space<vmem>>, vector<20x32xf32>
    tpu.vector_store %arg5[%c280, %c0_21], %32 {strides = array<i32>} : memref<340x32xf32, #tpu.memory_space<vmem>>, vector<20x32xf32>,
    %34 = vector.extract_strided_slice %3 {offsets = [0, 15], sizes = [20, 32], strides = [1, 1]} : vector<20x48xf32> to vector<20x32xf32>
    %c300 = arith.constant 300 : index
    %c0_22 = arith.constant 0 : index
    %35 = vector.load %arg5[%c300, %c0_22] : memref<340x32xf32, #tpu.memory_space<vmem>>, vector<20x32xf32>
    tpu.vector_store %arg5[%c300, %c0_22], %34 {strides = array<i32>} : memref<340x32xf32, #tpu.memory_space<vmem>>, vector<20x32xf32>,
    %36 = vector.extract_strided_slice %3 {offsets = [0, 16], sizes = [20, 32], strides = [1, 1]} : vector<20x48xf32> to vector<20x32xf32>
    %c320 = arith.constant 320 : index
    %c0_23 = arith.constant 0 : index
    %37 = vector.load %arg5[%c320, %c0_23] : memref<340x32xf32, #tpu.memory_space<vmem>>, vector<20x32xf32>
    tpu.vector_store %arg5[%c320, %c0_23], %36 {strides = array<i32>} : memref<340x32xf32, #tpu.memory_space<vmem>>, vector<20x32xf32>,
    %c0_24 = arith.constant 0 : index
    %c0_25 = arith.constant 0 : index
    %38 = vector.load %arg5[%c0_24, %c0_25] : memref<340x32xf32, #tpu.memory_space<vmem>>, vector<340x32xf32>
    %cst = arith.constant dense<0.000000e+00> : vector<420x32xf32>
    %39 = tpu.matmul %0, %38, %cst {dimension_numbers = #tpu.dot_dimension_numbers<[1], [0], [0], [1], [0, 0, 1, 1], [], []>} : vector<420x340xf32>, vector<340x32xf32>, vector<420x32xf32> -> vector<420x32xf32>
    %40 = vector.broadcast %1 : vector<420x1xf32> to vector<420x32xf32>
    %41 = arith.addf %39, %40 : vector<420x32xf32>
    %cst_26 = arith.constant 0.000000e+00 : f32
    %42 = vector.broadcast %cst_26 : f32 to vector<420x32xf32>
    %43 = arith.maximumf %41, %42 : vector<420x32xf32>
    %c0_27 = arith.constant 0 : index
    %c0_28 = arith.constant 0 : index
    %c0_29 = arith.constant 0 : index
    %44 = vector.load %arg4[%c0_27, %c0_28, %c0_29] : memref<1x420x32xf32, #tpu.memory_space<vmem>>, vector<1x420x32xf32>
    %45 = vector.shape_cast %44 : vector<1x420x32xf32> to vector<420x32xf32>
    %46 = vector.shape_cast %43 : vector<420x32xf32> to vector<1x420x32xf32>
    tpu.vector_store %arg4[%c0_27, %c0_28, %c0_29], %46 {strides = array<i32>} : memref<1x420x32xf32, #tpu.memory_space<vmem>>, vector<1x420x32xf32>,
    return
  }
  func.func @transform_0(%arg0: i32) -> (i32, i32, i32) {
    %c0_i32 = arith.constant 0 : i32
    %c0_i32_0 = arith.constant 0 : i32
    %c0_i32_1 = arith.constant 0 : i32
    return %arg0, %c0_i32, %c0_i32_0 : i32, i32, i32
  }
  func.func @transform_1(%arg0: i32) -> (i32, i32) {
    %c0_i32 = arith.constant 0 : i32
    %c0_i32_0 = arith.constant 0 : i32
    %c0_i32_1 = arith.constant 0 : i32
    return %c0_i32, %c0_i32_0 : i32, i32
  }
  func.func @transform_2(%arg0: i32) -> (i32, i32) {
    %c0_i32 = arith.constant 0 : i32
    %c0_i32_0 = arith.constant 0 : i32
    %c0_i32_1 = arith.constant 0 : i32
    return %c0_i32, %c0_i32_0 : i32, i32
  }
  func.func @transform_3(%arg0: i32) -> (i32, i32, i32) {
    %c0_i32 = arith.constant 0 : i32
    %c0_i32_0 = arith.constant 0 : i32
    %c0_i32_1 = arith.constant 0 : i32
    return %arg0, %c0_i32, %c0_i32_0 : i32, i32, i32
  }
}

</mosaic_0001>

<bundles_post_ra>
// kernel: tpu_custom_call.1
= control target key start
LH: loop header
LB: loop body
LE: loop exit
PB: predicated region body
PF: predicated region fallthrough
CT: control target
= control target key end

     0   :  { %8 = vsyncpa [#allocation4], 0  ;;  %s2009_s12 = smov 0   ;;  %s2760_s0 = inlined_call_operand.vmem [shape: f32[2,20,48], index: 0, kind: input, shape index: {}]   ;;  %s2761_s1 = inlined_call_operand.hbm [shape: f32[420,340], index: 1, kind: input, shape index: {}]   ;;  %s2762_s2 = inlined_call_operand.vmem [shape: f32[420,1], index: 2, kind: input, shape index: {}]   ;;  %s2763_s3 = inlined_call_operand.vmem [shape: f32[2,420,32], index: 3, kind: output, shape index: {}]  }
   0x1 LB: > { %s124_s15 = sshll.u32 %s2761_s1, 4  ;;  %s1776_s16 = sadd.s32 4294967295, %s1967_s12   ;;  %s1967_s12 = sphi %s2009_s12, %s14_s12   ;;  %s125_s15 = int_to_ptr.hbm [resolvable:$true] %s124_s15 }
   0x2   : > { %p1778_p0 = scmp.ge.s32.totalorder %s1967_s12, 1  ;;  %p113_p1 = scmp.lt.s32.totalorder %s1967_s12, 3 }
   0x3   : > { %p1894_p2 = scmp.eq.s32.totalorder %s1776_s16, 0  ;;  %s1969_s17 = smov [#allocation3]  }
   0x4   : > { %p114_p3 = pnand %p1778_p0, %p113_p1  ;;  %s126_s18 = sshll.u32 %s1969_s17, 4  ;;  %s127_s18 = int_to_ptr.vmem [resolvable:$true] %s126_s18 }
   0x5   : > { %s1970_s19 = smov 384   ;;  %s1971_s20 = smov 24  }
   0x6   : > { %p1890_p4 = pneg %p114_p3  ;;  %153 = sbr.rel (%p114_p3) target bundleno = 714 (0x2ca), region = 32 }
   0x8   : > { %p1891_p5 = pnand %p1894_p2, %p1890_p4 }
   0xa   : > { %1893 = dma.hbm_to_vmem [thread:$0]  (!%p1891_p5), %s125_s15, 20352, %s127_s18, [#allocation4], %s1970_s19, %s1970_s19, %s1971_s20  }
   0xb   : > { %1962 = dma.done.wait (%p1894_p2), [#allocation4], 20352  }
   0xc   : > { %1964 = vsyncadd (%p1894_p2), [#allocation4], 4294946944  ;;  %p178_p6 = scmp.lt.s32.totalorder %s1776_s16, 1  ;;  %s1972_s25 = smov 123   ;;  %vm403_vm0 = vcmask 261120   ;;  %vm406_vm1 = vcmask 257024  }
   0xd   : > { %s1973_s26 = smov 122   ;;  %s1974_s27 = smov 116   ;;  %vm1071_vm2 = vcmask 1043456   ;;  %v348_v32 = vld [vmem:[%s2762_s2 + $0x8] sm:$0xff]  ;;  %v347_v33 = vld [vmem:[%s2762_s2] sm:$0xff]  ;;  %v1988_v35 = vmov 0  }
   0xe   : > { %s2765_s16 = smov (!%p178_p6, %s1776_s16), 1  ;;  %s1975_s28 = smov 112   ;;  %1925 = vset.pattern.permute.xlu1 %v1988_v35  ;;  %1924 = vset.pattern.permute.xlu0 %v1988_v35  ;;  %v350_v40 = vld [vmem:[%s2762_s2 + $0x18] sm:$0xff]  ;;  %v352_v41 = vld [vmem:[%s2762_s2 + $0x28] sm:$0xff]  ;;  %v349_v47 = vld [vmem:[%s2762_s2 + $0x10] sm:$0xff]  ;;  %vm911_vm3 = vcmask 687104  }
   0xf   : > { %s1884_s21 = smul.u32 24, %s2765_s16  ;;  %s1976_s29 = smov 117   ;;  %1926 = vset.pattern.permute.xlu2 %v1988_v35  ;;  %v353_v48 = vld [vmem:[%s2762_s2 + $0x30] sm:$0xff]  ;;  %v355_v49 = vld [vmem:[%s2762_s2 + $0x40] sm:$0xff]  ;;  %v356_v58 = vld [vmem:[%s2762_s2 + $0x48] sm:$0xff] }
  0x10   : > { %s1977_s30 = smov 124   ;;  %s1978_s4 = smov 113   ;;  %v351_v57 = vld [vmem:[%s2762_s2 + $0x20] sm:$0xff]  ;;  %v358_v59 = vld [vmem:[%s2762_s2 + $0x58] sm:$0xff] }
  0x11   : > { %s182_s24 = scalar_lea.vmem %s2760_s0, %s1884_s21  ;;  %s1979_s5 = smov 114  }
  0x12   : > { %v2026_v0 = vld [vmem:[%s182_s24 + $0x8] sm:$0xff]  ;;  %v2028_v1 = vld [vmem:[%s182_s24] sm:$0xff]  ;;  %v2035_v2 = vld [vmem:[%s182_s24 + $0x10] sm:$0xf]  ;;  %s1980_s6 = smov 118   ;;  %s1981_s7 = smov 125  }
  0x13   : > { %461 = vrot.lane.b32.xlu1 %v2026_v0, %s1972_s25  ;;  %471 = vrot.lane.b32.xlu0 %v2028_v1, %s1973_s26  ;;  %s1982_s8 = smov 119   ;;  %s1983_s9 = smov 126   ;;  %404 = vst.msk [vmem:[#allocation2] sm:$0xff] %vm403_vm0, %v2028_v1 }
  0x14   : > { %545 = vrot.lane.b32.xlu2 %v2026_v0, %s1974_s27  ;;  %405 = vst.msk [vmem:[#allocation2 + $0x8] sm:$0xff] %vm403_vm0, %v2026_v0  ;;  %s1984_s10 = smov 115   ;;  %s1985_s11 = smov 120  }
  0x15   : > { %407 = vst.msk [vmem:[#allocation2 + $0x10] sm:$0xf] %vm406_vm1, %v2035_v2  ;;  %s1986_s13 = smov 127   ;;  %s1987_s14 = smov 121  }
  0x16   : > { %s1885_s22 = smul.u32 424, %s2765_s16 }
  0x1b   : > { %463 = vrot.lane.b32.xlu1 %v2035_v2, %s1972_s25  ;;  %595 = vrot.lane.b32.xlu0 %v2035_v2, %s1975_s28 }
  0x1c   : > { %593 = vrot.lane.b32.xlu2 %v2026_v0, %s1975_s28 }
  0x23   : > { %543 = vrot.lane.b32.xlu1 %v2028_v1, %s1974_s27  ;;  %459 = vrot.lane.b32.xlu0 %v2028_v1, %s1972_s25  ;;  %s2465_s25 = scalar_lea.vmem %s2763_s3, %s1885_s22 }
  0x24   : > { %591 = vrot.lane.b32.xlu2 %v2028_v1, %s1975_s28 }
  0x2b   : > { %533 = vrot.lane.b32.xlu1 %v2026_v0, %s1976_s29  ;;  %451 = vrot.lane.b32.xlu0 %v2035_v2, %s1977_s30 }
  0x2c   : > { %535 = vrot.lane.b32.xlu2 %v2035_v2, %s1976_s29 }
  0x33   : > { %583 = vrot.lane.b32.xlu1 %v2035_v2, %s1978_s4  ;;  %581 = vrot.lane.b32.xlu0 %v2026_v0, %s1978_s4 }
  0x34   : > { %449 = vrot.lane.b32.xlu2 %v2026_v0, %s1977_s30 }
  0x3b   : > { %579 = vrot.lane.b32.xlu1 %v2028_v1, %s1978_s4  ;;  %531 = vrot.lane.b32.xlu0 %v2028_v1, %s1976_s29 }
  0x3c   : > { %447 = vrot.lane.b32.xlu2 %v2028_v1, %s1977_s30 }
  0x43   : > { %571 = vrot.lane.b32.xlu1 %v2035_v2, %s1979_s5  ;;  %523 = vrot.lane.b32.xlu0 %v2035_v2, %s1980_s6 }
  0x44   : > { %437 = vrot.lane.b32.xlu2 %v2026_v0, %s1981_s7 }
  0x4b   : > { %521 = vrot.lane.b32.xlu1 %v2026_v0, %s1980_s6  ;;  %439 = vrot.lane.b32.xlu0 %v2035_v2, %s1981_s7 }
  0x4c   : > { %569 = vrot.lane.b32.xlu2 %v2026_v0, %s1979_s5 }
  0x53   : > { %519 = vrot.lane.b32.xlu1 %v2028_v1, %s1980_s6  ;;  %435 = vrot.lane.b32.xlu0 %v2028_v1, %s1981_s7 }
  0x54   : > { %567 = vrot.lane.b32.xlu2 %v2028_v1, %s1979_s5 }
  0x5b   : > { %509 = vrot.lane.b32.xlu1 %v2026_v0, %s1982_s8  ;;  %427 = vrot.lane.b32.xlu0 %v2035_v2, %s1983_s9 }
  0x5c   : > { %511 = vrot.lane.b32.xlu2 %v2035_v2, %s1982_s8 }
  0x63   : > { %559 = vrot.lane.b32.xlu1 %v2035_v2, %s1984_s10  ;;  %557 = vrot.lane.b32.xlu0 %v2026_v0, %s1984_s10 }
  0x64   : > { %425 = vrot.lane.b32.xlu2 %v2026_v0, %s1983_s9 }
  0x6b   : > { %555 = vrot.lane.b32.xlu1 %v2028_v1, %s1984_s10  ;;  %507 = vrot.lane.b32.xlu0 %v2028_v1, %s1982_s8 }
  0x6c   : > { %423 = vrot.lane.b32.xlu2 %v2028_v1, %s1983_s9 }
  0x6e   : > { %v546_v3 = vpop.permute.xlu2 %545 }
  0x6f   : > { %553 = vst.msk [vmem:[#allocation2 + $0xf8] sm:$0xff] %vm403_vm0, %v546_v3  ;;  %v361_v3 = vld [vmem:[%s2762_s2 + $0x70] sm:$0xff] }
  0x73   : > { %547 = vrot.lane.b32.xlu1 %v2035_v2, %s1974_s27  ;;  %499 = vrot.lane.b32.xlu0 %v2035_v2, %s1985_s11 }
  0x74   : > { %413 = vrot.lane.b32.xlu2 %v2026_v0, %s1986_s13 }
  0x76   : > { %v594_v4 = vpop.permute.xlu2 %593  ;;  %v2082_v5 = vld [vmem:[#allocation2 + $0xf8] sm:$0xff] }
  0x77   : > { %601 = vst.msk [vmem:[#allocation2 + $0x148] sm:$0xff] %vm403_vm0, %v594_v4  ;;  %1251 = vmatpush.msra.mxu1 %v2082_v5 }
  0x7b   : > { %497 = vrot.lane.b32.xlu1 %v2026_v0, %s1985_s11  ;;  %415 = vrot.lane.b32.xlu0 %v2035_v2, %s1986_s13 }
  0x7c   : > { %411 = vrot.lane.b32.xlu2 %v2028_v1, %s1986_s13 }
  0x7e   : > { %v592_v6 = vpop.permute.xlu2 %591  ;;  %v2107_v18 = vld [vmem:[#allocation2 + $0x148] sm:$0xff] }
  0x7f   : > { %600 = vst.msk [vmem:[#allocation2 + $0x140] sm:$0xff] %vm403_vm0, %v592_v6 }
  0x83   : > { %485 = vrot.lane.b32.xlu1 %v2026_v0, %s1987_s14  ;;  %495 = vrot.lane.b32.xlu0 %v2028_v1, %s1985_s11 }
  0x84   : > { %487 = vrot.lane.b32.xlu2 %v2035_v2, %s1987_s14 }
  0x85   : > { %v462_v7 = vpop.permute.xlu1 %461  ;;  %v472_v8 = vpop.permute.xlu0 %471 }
  0x86   : > { %469 = vst.msk [vmem:[#allocation2 + $0x6c] sm:$0xff] %vm403_vm0, %v462_v7  ;;  %v536_v9 = vpop.permute.xlu2 %535  ;;  %v2112_v20 = vld [vmem:[#allocation2 + $0x140] sm:$0xff] }
  0x87   : > { %480 = vst.msk [vmem:[#allocation2 + $0x78] sm:$0xff] %vm403_vm0, %v472_v8 }
  0x88   : > { %542 = vst.msk [vmem:[#allocation2 + $0xec] sm:$0xf] %vm406_vm1, %v536_v9 }
  0x8b   : > { %475 = vrot.lane.b32.xlu1 %v2035_v2, %s1973_s26  ;;  %483 = vrot.lane.b32.xlu0 %v2028_v1, %s1987_s14  ;;  %v354_v1 = vld [vmem:[%s2762_s2 + $0x38] sm:$0xff]  ;;  %v359_v2 = vld [vmem:[%s2762_s2 + $0x60] sm:$0xff] }
  0x8c   : > { %473 = vrot.lane.b32.xlu2 %v2026_v0, %s1973_s26 }
  0x8d   : > { %v464_v10 = vpop.permute.xlu1 %463  ;;  %v596_v11 = vpop.permute.xlu0 %595 }
  0x8e   : > { %470 = vst.msk [vmem:[#allocation2 + $0x74] sm:$0xf] %vm406_vm1, %v464_v10  ;;  %v618_v12 = vld [vmem:[#allocation2 + $0x78] sm:$0xff]  ;;  %v450_v13 = vpop.permute.xlu2 %449  ;;  %v357_v10 = vld [vmem:[%s2762_s2 + $0x50] sm:$0xff] }
  0x8f   : > { %602 = vst.msk [vmem:[#allocation2 + $0x150] sm:$0xf] %vm406_vm1, %v596_v11  ;;  %1075 = vmatpush.msra.mxu0 %v618_v12  ;;  %1841 = vmatpush.msra.mxu3 %v618_v12  ;;  %v362_v11 = vld [vmem:[%s2762_s2 + $0x78] sm:$0xff]  ;;  %v364_v12 = vld [vmem:[%s2762_s2 + $0x88] sm:$0xff] }
  0x90   : > { %457 = vst.msk [vmem:[#allocation2 + $0x58] sm:$0xff] %vm403_vm0, %v450_v13 }
  0x93   : > { %653 = vperm.xlu1 %1925, %v348_v32   ;;  %648 = vperm.xlu0 %1924, %v347_v33   ;;  %v363_v32 = vld [vmem:[%s2762_s2 + $0x80] sm:$0xff]  ;;  %v368_v33 = vld [vmem:[%s2762_s2 + $0xa8] sm:$0xff] }
  0x94   : > { %658 = vperm.xlu2 %1926, %v349_v47  }
  0x95   : > { %v544_v14 = vpop.permute.xlu1 %543  ;;  %v460_v15 = vpop.permute.xlu0 %459  ;;  %v617_v16 = vld [vmem:[#allocation2 + $0x70] sm:$0xff] }
  0x96   : > { %552 = vst.msk [vmem:[#allocation2 + $0xf0] sm:$0xff] %vm403_vm0, %v544_v14  ;;  %1076 = vmatpush.msra.mxu0 %v617_v16  ;;  %1842 = vmatpush.msra.mxu3 %v617_v16  ;;  %v2105_v17 = vld [vmem:[#allocation2 + $0x150] sm:$0xf]  ;;  %v448_v19 = vpop.permute.xlu2 %447 }
  0x97   : > { %468 = vst.msk [vmem:[#allocation2 + $0x64] sm:$0xff] %vm403_vm0, %v460_v15  ;;  %1785 = vmatpush.msk.msra.mxu2 %vm1071_vm2, %v2105_v17  ;;  %v614_v30 = vld [vmem:[#allocation2 + $0x58] sm:$0xff] }
  0x98   : > { %456 = vst.msk [vmem:[#allocation2 + $0x50] sm:$0xff] %vm403_vm0, %v448_v19 }
  0x99   : > { %1433 = vmatpush.msra.mxu2 %v2107_v18 }
  0x9b   : > { %1434 = vmatpush.msra.mxu2 %v2112_v20  ;;  %663 = vperm.xlu1 %1925, %v350_v40  }
  0x9c   : > { %673 = vperm.xlu0 %1924, %v352_v41   ;;  %668 = vperm.xlu2 %1926, %v351_v57   ;;  %v366_v41 = vld [vmem:[%s2762_s2 + $0x98] sm:$0xff]  ;;  %v376_v57 = vld [vmem:[%s2762_s2 + $0xe8] sm:$0xff] }
  0x9d   : > { %v534_v21 = vpop.permute.xlu1 %533  ;;  %v452_v22 = vpop.permute.xlu0 %451  ;;  %v2117_v23 = vld [vmem:[#allocation2 + $0xf0] sm:$0xff] }
  0x9e   : > { %541 = vst.msk [vmem:[#allocation2 + $0xe4] sm:$0xff] %vm403_vm0, %v534_v21  ;;  %v616_v24 = vld [vmem:[#allocation2 + $0x68] sm:$0xff]  ;;  %1252 = vmatpush.msra.mxu1 %v2117_v23  ;;  %v438_v25 = vpop.permute.xlu2 %437 }
  0x9f   : > { %458 = vst.msk [vmem:[#allocation2 + $0x60] sm:$0xf] %vm406_vm1, %v452_v22  ;;  %1077 = vmatpush.msra.mxu0 %v616_v24  ;;  %1843 = vmatpush.msra.mxu3 %v616_v24  ;;  %v613_v34 = vld [vmem:[#allocation2 + $0x50] sm:$0xff]  ;;  %v360_v24 = vld [vmem:[%s2762_s2 + $0x68] sm:$0xff] }
  0xa0   : > { %445 = vst.msk [vmem:[#allocation2 + $0x44] sm:$0xff] %vm403_vm0, %v438_v25  ;;  %v365_v25 = vld [vmem:[%s2762_s2 + $0x90] sm:$0xff] }
  0xa3   : > { %678 = vperm.xlu1 %1925, %v353_v48  }
  0xa4   : > { %688 = vperm.xlu0 %1924, %v355_v49   ;;  %683 = vperm.xlu2 %1926, %v354_v1  }
  0xa5   : > { %v584_v26 = vpop.permute.xlu1 %583  ;;  %v582_v27 = vpop.permute.xlu0 %581  ;;  %v2123_v28 = vld [vmem:[#allocation2 + $0xe8] sm:$0xff] }
  0xa6   : > { %590 = vst.msk [vmem:[#allocation2 + $0x13c] sm:$0xf] %vm406_vm1, %v584_v26  ;;  %v615_v29 = vld [vmem:[#allocation2 + $0x60] sm:$0xff]  ;;  %1253 = vmatpush.msra.mxu1 %v2123_v28  ;;  %v570_v31 = vpop.permute.xlu2 %569 }
  0xa7   : > { %589 = vst.msk [vmem:[#allocation2 + $0x134] sm:$0xff] %vm403_vm0, %v582_v27  ;;  %1078 = vmatpush.msra.mxu0 %v615_v29  ;;  %1844 = vmatpush.msra.mxu3 %v615_v29  ;;  %v367_v26 = vld [vmem:[%s2762_s2 + $0xa0] sm:$0xff] }
  0xa8   : > { %577 = vst.msk [vmem:[#allocation2 + $0x120] sm:$0xff] %vm403_vm0, %v570_v31 }
  0xa9   : > { %1079 = vmatpush.msra.mxu0 %v614_v30  ;;  %1845 = vmatpush.msra.mxu3 %v614_v30 }
  0xab   : > { %1080 = vmatpush.msra.mxu0 %v613_v34  ;;  %1846 = vmatpush.msra.mxu3 %v613_v34  ;;  %v370_v34 = vld [vmem:[%s2762_s2 + $0xb8] sm:$0xff] }
  0xac   : > { %693 = vperm.xlu1 %1925, %v356_v58   ;;  %703 = vperm.xlu0 %1924, %v358_v59  }
  0xad   : > { %v580_v36 = vpop.permute.xlu1 %579  ;;  %v532_v37 = vpop.permute.xlu0 %531  ;;  %698 = vperm.xlu2 %1926, %v357_v10  }
  0xae   : > { %588 = vst.msk [vmem:[#allocation2 + $0x12c] sm:$0xff] %vm403_vm0, %v580_v36  ;;  %v2136_v38 = vld [vmem:[#allocation2 + $0x138] sm:$0xff]  ;;  %v568_v39 = vpop.permute.xlu2 %567 }
  0xaf   : > { %540 = vst.msk [vmem:[#allocation2 + $0xdc] sm:$0xff] %vm403_vm0, %v532_v37  ;;  %1435 = vmatpush.msra.mxu2 %v2136_v38  ;;  %v2167_v53 = vld [vmem:[#allocation2 + $0x120] sm:$0xff] }
  0xb0   : > { %576 = vst.msk [vmem:[#allocation2 + $0x118] sm:$0xff] %vm403_vm0, %v568_v39 }
  0xb4   : > { %708 = vperm.xlu1 %1925, %v359_v2   ;;  %718 = vperm.xlu0 %1924, %v361_v3   ;;  %v604_v2 = vld [vmem:[#allocation2 + $0x8] sm:$0xff] }
  0xb5   : > { %v572_v42 = vpop.permute.xlu1 %571  ;;  %v524_v43 = vpop.permute.xlu0 %523  ;;  %v2147_v44 = vld [vmem:[#allocation2 + $0x130] sm:$0xff]  ;;  %713 = vperm.xlu2 %1926, %v360_v24   ;;  %v372_v3 = vld [vmem:[%s2762_s2 + $0xc8] sm:$0xff] }
  0xb6   : > { %578 = vst.msk [vmem:[#allocation2 + $0x128] sm:$0xf] %vm406_vm1, %v572_v42  ;;  %v2150_v45 = vld [vmem:[#allocation2 + $0xe0] sm:$0xff]  ;;  %1436 = vmatpush.msra.mxu2 %v2147_v44  ;;  %v512_v46 = vpop.permute.xlu2 %511  ;;  %v191_v24 = vld [vmem:[#allocation3 + $0x18] sm:$0xff] }
  0xb7   : > { %530 = vst.msk [vmem:[#allocation2 + $0xd8] sm:$0xf] %vm406_vm1, %v524_v43  ;;  %1254 = vmatpush.msra.mxu1 %v2150_v45  ;;  %v2175_v56 = vld [vmem:[#allocation2 + $0x118] sm:$0xff]  ;;  %v371_v42 = vld [vmem:[%s2762_s2 + $0xc0] sm:$0xff]  ;;  %v373_v43 = vld [vmem:[%s2762_s2 + $0xd0] sm:$0xff] }
  0xb8   : > { %518 = vst.msk [vmem:[#allocation2 + $0xc4] sm:$0xf] %vm406_vm1, %v512_v46  ;;  %v190_v46 = vld [vmem:[#allocation3 + $0x10] sm:$0xff] }
  0xbc   : > { %723 = vperm.xlu1 %1925, %v362_v11   ;;  %733 = vperm.xlu0 %1924, %v364_v12   ;;  %v188_v11 = vld [vmem:[#allocation3] sm:$0xff] }
  0xbd   : > { %v522_v50 = vpop.permute.xlu1 %521  ;;  %v440_v51 = vpop.permute.xlu0 %439  ;;  %v2165_v52 = vld [vmem:[#allocation2 + $0x128] sm:$0xff]  ;;  %728 = vperm.xlu2 %1926, %v363_v32  }
  0xbe   : > { %529 = vst.msk [vmem:[#allocation2 + $0xd0] sm:$0xff] %vm403_vm0, %v522_v50  ;;  %v2170_v54 = vld [vmem:[#allocation2 + $0xd8] sm:$0xff]  ;;  %1437 = vmatpush.msra.mxu2 %v2165_v52  ;;  %v426_v55 = vpop.permute.xlu2 %425  ;;  %v194_v32 = vld [vmem:[#allocation3 + $0x30] sm:$0xff] }
  0xbf   : > { %446 = vst.msk [vmem:[#allocation2 + $0x4c] sm:$0xf] %vm406_vm1, %v440_v51  ;;  %1255 = vmatpush.msra.mxu1 %v2170_v54  ;;  %v369_v51 = vld [vmem:[%s2762_s2 + $0xb0] sm:$0xff] }
  0xc0   : > { %1438 = vmatpush.msra.mxu2 %v2167_v53  ;;  %433 = vst.msk [vmem:[#allocation2 + $0x30] sm:$0xff] %vm403_vm0, %v426_v55  ;;  %v374_v55 = vld [vmem:[%s2762_s2 + $0xd8] sm:$0xff] }
  0xc2   : > { %1439 = vmatpush.msra.mxu2 %v2175_v56 }
  0xc4   : > { %738 = vperm.xlu1 %1925, %v365_v25   ;;  %748 = vperm.xlu0 %1924, %v367_v26   ;;  %v311_v25 = vld [vmem:[#allocation3 + $0x3d8] sm:$0xff] }
  0xc5   : > { %v520_v60 = vpop.permute.xlu1 %519  ;;  %v436_v61 = vpop.permute.xlu0 %435  ;;  %v2189_v62 = vld [vmem:[#allocation2 + $0xd0] sm:$0xff]  ;;  %743 = vperm.xlu2 %1926, %v366_v41  }
  0xc6   : > { %528 = vst.msk [vmem:[#allocation2 + $0xc8] sm:$0xff] %vm403_vm0, %v520_v60  ;;  %v612_v63 = vld [vmem:[#allocation2 + $0x48] sm:$0xff]  ;;  %1256 = vmatpush.msra.mxu1 %v2189_v62  ;;  %v424_v0 = vpop.permute.xlu2 %423  ;;  %v193_v60 = vld [vmem:[#allocation3 + $0x28] sm:$0xff]  ;;  %v199_v26 = vld [vmem:[#allocation3 + $0x58] sm:$0xff] }
  0xc7   : > { %444 = vst.msk [vmem:[#allocation2 + $0x3c] sm:$0xff] %vm403_vm0, %v436_v61  ;;  %1081 = vmatpush.msra.mxu0 %v612_v63  ;;  %1847 = vmatpush.msra.mxu3 %v612_v63  ;;  %v609_v19 = vld [vmem:[#allocation2 + $0x30] sm:$0xff] }
  0xc8   : > { %432 = vst.msk [vmem:[#allocation2 + $0x28] sm:$0xff] %vm403_vm0, %v424_v0  ;;  %v195_v41 = vld [vmem:[#allocation3 + $0x38] sm:$0xff] }
  0xcc   : > { %753 = vperm.xlu1 %1925, %v368_v33   ;;  %763 = vperm.xlu0 %1924, %v370_v34   ;;  %v202_v33 = vld [vmem:[#allocation3 + $0x70] sm:$0xff]  ;;  %v381_v34 = vld [vmem:[%s2762_s2 + $0x110] sm:$0xff] }
  0xcd   : > { %v510_v4 = vpop.permute.xlu1 %509  ;;  %v428_v6 = vpop.permute.xlu0 %427  ;;  %v2204_v7 = vld [vmem:[#allocation2 + $0xc8] sm:$0xff]  ;;  %758 = vperm.xlu2 %1926, %v369_v51  }
  0xce   : > { %517 = vst.msk [vmem:[#allocation2 + $0xbc] sm:$0xff] %vm403_vm0, %v510_v4  ;;  %v611_v8 = vld [vmem:[#allocation2 + $0x40] sm:$0xff]  ;;  %1257 = vmatpush.msra.mxu1 %v2204_v7  ;;  %v414_v9 = vpop.permute.xlu2 %413  ;;  %v377_v4 = vld [vmem:[%s2762_s2 + $0xf0] sm:$0xff]  ;;  %v198_v51 = vld [vmem:[#allocation3 + $0x50] sm:$0xff] }
  0xcf   : > { %434 = vst.msk [vmem:[#allocation2 + $0x38] sm:$0xf] %vm406_vm1, %v428_v6  ;;  %1082 = vmatpush.msra.mxu0 %v611_v8  ;;  %1848 = vmatpush.msra.mxu3 %v611_v8  ;;  %v608_v22 = vld [vmem:[#allocation2 + $0x28] sm:$0xff]  ;;  %v379_v6 = vld [vmem:[%s2762_s2 + $0x100] sm:$0xff] }
  0xd0   : > { %421 = vst.msk [vmem:[#allocation2 + $0x1c] sm:$0xff] %vm403_vm0, %v414_v9  ;;  %v603_v8 = vld [vmem:[#allocation2] sm:$0xff] }
  0xd4   : > { %768 = vperm.xlu1 %1925, %v371_v42   ;;  %778 = vperm.xlu0 %1924, %v373_v43   ;;  %v384_v42 = vld [vmem:[%s2762_s2 + $0x128] sm:$0xff]  ;;  %v389_v43 = vld [vmem:[%s2762_s2 + $0x150] sm:$0xff] }
  0xd5   : > { %v560_v13 = vpop.permute.xlu1 %559  ;;  %v558_v14 = vpop.permute.xlu0 %557  ;;  %v2219_v15 = vld [vmem:[#allocation2 + $0xc0] sm:$0xff]  ;;  %773 = vperm.xlu2 %1926, %v372_v3  }
  0xd6   : > { %566 = vst.msk [vmem:[#allocation2 + $0x114] sm:$0xf] %vm406_vm1, %v560_v13  ;;  %v610_v16 = vld [vmem:[#allocation2 + $0x38] sm:$0xff]  ;;  %1258 = vmatpush.msra.mxu1 %v2219_v15  ;;  %v412_v21 = vpop.permute.xlu2 %411 }
  0xd7   : > { %565 = vst.msk [vmem:[#allocation2 + $0x10c] sm:$0xff] %vm403_vm0, %v558_v14  ;;  %1083 = vmatpush.msra.mxu0 %v610_v16  ;;  %1849 = vmatpush.msra.mxu3 %v610_v16  ;;  %v308_v13 = vld [vmem:[#allocation3 + $0x3c0] sm:$0xff] }
  0xd8   : > { %420 = vst.msk [vmem:[#allocation2 + $0x14] sm:$0xff] %vm403_vm0, %v412_v21  ;;  %v196_v14 = vld [vmem:[#allocation3 + $0x40] sm:$0xff]  ;;  %v380_v21 = vld [vmem:[%s2762_s2 + $0x108] sm:$0xff] }
  0xd9   : > { %1084 = vmatpush.msra.mxu0 %v609_v19  ;;  %1850 = vmatpush.msra.mxu3 %v609_v19  ;;  %v375_v19 = vld [vmem:[%s2762_s2 + $0xe0] sm:$0xff] }
  0xdb   : > { %1085 = vmatpush.msra.mxu0 %v608_v22  ;;  %1851 = vmatpush.msra.mxu3 %v608_v22  ;;  %v382_v22 = vld [vmem:[%s2762_s2 + $0x118] sm:$0xff] }
  0xdc   : > { %783 = vperm.xlu1 %1925, %v374_v55   ;;  %793 = vperm.xlu0 %1924, %v376_v57   ;;  %v387_v55 = vld [vmem:[%s2762_s2 + $0x140] sm:$0xff] }
  0xdd   : > { %v556_v27 = vpop.permute.xlu1 %555  ;;  %v508_v29 = vpop.permute.xlu0 %507  ;;  %788 = vperm.xlu2 %1926, %v375_v19  }
  0xde   : > { %564 = vst.msk [vmem:[#allocation2 + $0x104] sm:$0xff] %vm403_vm0, %v556_v27  ;;  %v2235_v30 = vld [vmem:[#allocation2 + $0x110] sm:$0xff]  ;;  %v488_v31 = vpop.permute.xlu2 %487 }
  0xdf   : > { %516 = vst.msk [vmem:[#allocation2 + $0xb4] sm:$0xff] %vm403_vm0, %v508_v29  ;;  %1440 = vmatpush.msra.mxu2 %v2235_v30  ;;  %v606_v0 = vld [vmem:[#allocation2 + $0x18] sm:$0xff]  ;;  %v605_v1 = vld [vmem:[#allocation2 + $0x10] sm:$0xff] }
  0xe0   : > { %494 = vst.msk [vmem:[#allocation2 + $0x9c] sm:$0xf] %vm406_vm1, %v488_v31  ;;  %v383_v31 = vld [vmem:[%s2762_s2 + $0x120] sm:$0xff] }
  0xe4   : > { %798 = vperm.xlu1 %1925, %v377_v4   ;;  %808 = vperm.xlu0 %1924, %v379_v6   ;;  %v220_v4 = vld [vmem:[#allocation3 + $0x100] sm:$0xff]  ;;  %v210_v6 = vld [vmem:[#allocation3 + $0xb0] sm:$0xff] }
  0xe5   : > { %v548_v35 = vpop.permute.xlu1 %547  ;;  %v500_v36 = vpop.permute.xlu0 %499  ;;  %v2249_v37 = vld [vmem:[#allocation2 + $0x108] sm:$0xff] }
  0xe6   : > { %554 = vst.msk [vmem:[#allocation2 + $0x100] sm:$0xf] %vm406_vm1, %v548_v35  ;;  %v2252_v39 = vld [vmem:[#allocation2 + $0xb8] sm:$0xff]  ;;  %1441 = vmatpush.msra.mxu2 %v2249_v37  ;;  %v474_v40 = vpop.permute.xlu2 %473 }
  0xe7   : > { %506 = vst.msk [vmem:[#allocation2 + $0xb0] sm:$0xf] %vm406_vm1, %v500_v36  ;;  %1259 = vmatpush.msra.mxu1 %v2252_v39  ;;  %v197_v36 = vld [vmem:[#allocation3 + $0x48] sm:$0xff] }
  0xe8   : > { %481 = vst.msk [vmem:[#allocation2 + $0x80] sm:$0xff] %vm403_vm0, %v474_v40  ;;  %v205_v40 = vld [vmem:[#allocation3 + $0x88] sm:$0xff] }
  0xec   : > { %813 = vperm.xlu1 %1925, %v380_v21   ;;  %823 = vperm.xlu0 %1924, %v382_v22   ;;  %v226_v21 = vld [vmem:[#allocation3 + $0x130] sm:$0xff] }
  0xed   : > { %v498_v47 = vpop.permute.xlu1 %497  ;;  %v416_v48 = vpop.permute.xlu0 %415  ;;  %v2267_v49 = vld [vmem:[#allocation2 + $0x100] sm:$0xff]  ;;  %v338_v22 = vld [vmem:[#allocation3 + $0x4b0] sm:$0xff] }
  0xee   : > { %505 = vst.msk [vmem:[#allocation2 + $0xa8] sm:$0xff] %vm403_vm0, %v498_v47  ;;  %v2270_v50 = vld [vmem:[#allocation2 + $0xb0] sm:$0xff]  ;;  %1442 = vmatpush.msra.mxu2 %v2267_v49  ;;  %v2344_v35 = vpop.permute.xlu2 %658  ;;  %v200_v47 = vld [vmem:[#allocation3 + $0x60] sm:$0xff] }
  0xef   : > { %422 = vst.msk [vmem:[#allocation2 + $0x24] sm:$0xf] %vm406_vm1, %v416_v48  ;;  %1260 = vmatpush.msra.mxu1 %v2270_v50  ;;  %1786 = vmatmul.msk.f32.vlgmr.msra.gmra.mxu2 %vm911_vm3, %v190_v46  ;;  %v619_v29 = vld [vmem:[#allocation2 + $0x80] sm:$0xff]  ;;  %v208_v48 = vld [vmem:[#allocation3 + $0xa0] sm:$0xff] }
  0xf4   : > { %828 = vperm.xlu1 %1925, %v383_v31   ;;  %v224_v31 = vld [vmem:[#allocation3 + $0x120] sm:$0xff] }
  0xf5   : > { %v486_v58 = vpop.permute.xlu1 %485  ;;  %v496_v59 = vpop.permute.xlu0 %495  ;;  %v2285_v61 = vld [vmem:[#allocation2 + $0xa8] sm:$0xff] }
  0xf6   : > { %493 = vst.msk [vmem:[#allocation2 + $0x94] sm:$0xff] %vm403_vm0, %v486_v58  ;;  %v607_v63 = vld [vmem:[#allocation2 + $0x20] sm:$0xff]  ;;  %1261 = vmatpush.msra.mxu1 %v2285_v61  ;;  %v2360_v46 = vpop.permute.xlu2 %668  ;;  %v203_v58 = vld [vmem:[#allocation3 + $0x78] sm:$0xff] }
  0xf7   : > { %504 = vst.msk [vmem:[#allocation2 + $0xa0] sm:$0xff] %vm403_vm0, %v496_v59  ;;  %1086 = vmatpush.msra.mxu0 %v607_v63  ;;  %1852 = vmatpush.msra.mxu3 %v607_v63  ;;  %v211_v59 = vld [vmem:[#allocation3 + $0xb8] sm:$0xff]  ;;  %v204_v63 = vld [vmem:[#allocation3 + $0x80] sm:$0xff] }
  0xf8   : > { %1787 = vmatmul.msk.f32.gmra.mxu2 %vm911_vm3, %v193_v60  ;;  %v391_v60 = vld [vmem:[%s2762_s2 + $0x160] sm:$0xff] }
  0xf9   : > { %1087 = vmatpush.msra.mxu0 %v606_v0  ;;  %1853 = vmatpush.msra.mxu3 %v606_v0  ;;  %v217_v0 = vld [vmem:[#allocation3 + $0xe8] sm:$0xff] }
  0xfb   : > { %1088 = vmatpush.msra.mxu0 %v605_v1  ;;  %1854 = vmatpush.msra.mxu3 %v605_v1  ;;  %v329_v1 = vld [vmem:[#allocation3 + $0x468] sm:$0xff] }
  0xfd   : > { %1089 = vmatpush.msra.mxu0 %v604_v2  ;;  %1855 = vmatpush.msra.mxu3 %v604_v2  ;;  %v476_v9 = vpop.permute.xlu1 %475  ;;  %v484_v10 = vpop.permute.xlu0 %483  ;;  %v2304_v16 = vld [vmem:[#allocation2 + $0x98] sm:$0xff] }
  0xfe   : > { %482 = vst.msk [vmem:[#allocation2 + $0x88] sm:$0xf] %vm406_vm1, %v476_v9  ;;  %v2301_v12 = vld [vmem:[#allocation2 + $0xa0] sm:$0xff]  ;;  %v2369_v57 = vpop.permute.xlu2 %683  ;;  %v390_v2 = vld [vmem:[%s2762_s2 + $0x158] sm:$0xff]  ;;  %v215_v9 = vld [vmem:[#allocation3 + $0xd8] sm:$0xff] }
  0xff   : > { %492 = vst.msk [vmem:[#allocation2 + $0x8c] sm:$0xff] %vm403_vm0, %v484_v10  ;;  %1090 = vmatpush.msra.mxu0 %v603_v8  ;;  %1856 = vmatpush.msra.mxu3 %v603_v8  ;;  %v394_v8 = vld [vmem:[%s2762_s2 + $0x178] sm:$0xff] }
 0x100   : > { %1262 = vmatpush.msra.mxu1 %v2301_v12  ;;  %1091 = vmatmul.f32.vlgmr.msra.gmra.mxu0 %v188_v11  ;;  %v223_v11 = vld [vmem:[#allocation3 + $0x118] sm:$0xff] }
 0x101   : > { %1211 = vmatmul.f32.vlgmr.msra.gmra.mxu3 %v308_v13  ;;  %1788 = vmatmul.msk.f32.gmra.mxu2 %vm911_vm3, %v196_v14  ;;  %v213_v13 = vld [vmem:[#allocation3 + $0xc8] sm:$0xff] }
 0x102   : > { %1857 = vmatpush.msrb.mxu3 %v2082_v5  ;;  %1263 = vmatpush.msra.mxu1 %v2304_v16  ;;  %v395_v14 = vld [vmem:[%s2762_s2 + $0x180] sm:$0xff] }
 0x104   : > { %1858 = vmatpush.msrb.mxu3 %v2117_v23  ;;  %v189_v23 = vld [vmem:[#allocation3 + $0x8] sm:$0xff] }
 0x106   : > { %1859 = vmatpush.msrb.mxu3 %v2123_v28  ;;  %v621_v5 = vld [vmem:[#allocation2 + $0x90] sm:$0xff]  ;;  %v620_v27 = vld [vmem:[#allocation2 + $0x88] sm:$0xff]  ;;  %v378_v28 = vld [vmem:[%s2762_s2 + $0xf8] sm:$0xff] }
 0x107   : > { %1264 = vmatpush.msra.mxu1 %v621_v5  ;;  %803 = vperm.xlu2 %1926, %v378_v28   ;;  %v397_v28 = vld [vmem:[%s2762_s2 + $0x190] sm:$0xff] }
 0x108   : > { %1860 = vmatpush.msrb.mxu3 %v2150_v45  ;;  %1094 = vmatmul.f32.gmra.mxu0 %v191_v24  ;;  %v385_v45 = vld [vmem:[%s2762_s2 + $0x130] sm:$0xff]  ;;  %v216_v24 = vld [vmem:[#allocation3 + $0xe0] sm:$0xff] }
 0x109   : > { %1214 = vmatmul.f32.gmra.mxu3 %v311_v25  ;;  %1789 = vmatmul.msk.f32.gmra.mxu2 %vm911_vm3, %v199_v26  ;;  %v221_v25 = vld [vmem:[#allocation3 + $0x108] sm:$0xff] }
 0x10a   : > { %1861 = vmatpush.msrb.mxu3 %v2170_v54  ;;  %1265 = vmatpush.msra.mxu1 %v620_v27  ;;  %v314_v54 = vld [vmem:[#allocation3 + $0x3f0] sm:$0xff]  ;;  %v229_v26 = vld [vmem:[#allocation3 + $0x148] sm:$0xff] }
 0x10b   : > { %838 = vperm.xlu0 %1924, %v385_v45   ;;  %v232_v45 = vld [vmem:[#allocation3 + $0x160] sm:$0xff] }
 0x10c   : > { %1862 = vmatpush.msrb.mxu3 %v2189_v62  ;;  %1266 = vmatpush.msra.mxu1 %v619_v29  ;;  %v192_v62 = vld [vmem:[#allocation3 + $0x20] sm:$0xff] }
 0x10d   : > { %1267 = vmatmul.f32.vlgmr.msra.gmra.mxu1 %v189_v23  ;;  %v219_v23 = vld [vmem:[#allocation3 + $0xf8] sm:$0xff] }
 0x10e   : > { %1863 = vmatpush.msrb.mxu3 %v2204_v7  ;;  %v386_v7 = vld [vmem:[%s2762_s2 + $0x138] sm:$0xff] }
 0x10f   : > { %818 = vperm.xlu2 %1926, %v381_v34   ;;  %843 = vperm.xlu1 %1925, %v386_v7   ;;  %v227_v34 = vld [vmem:[#allocation3 + $0x138] sm:$0xff] }
 0x110   : > { %1864 = vmatpush.msrb.mxu3 %v2219_v15  ;;  %1097 = vmatmul.f32.gmra.mxu0 %v194_v32  ;;  %v388_v15 = vld [vmem:[%s2762_s2 + $0x148] sm:$0xff]  ;;  %v235_v7 = vld [vmem:[#allocation3 + $0x178] sm:$0xff] }
 0x111   : > { %1217 = vmatmul.f32.gmra.mxu3 %v314_v54  ;;  %1790 = vmatmul.msk.f32.gmra.mxu2 %vm911_vm3, %v202_v33  ;;  %v344_v54 = vld [vmem:[#allocation3 + $0x4e0] sm:$0xf]  ;;  %v222_v33 = vld [vmem:[#allocation3 + $0x110] sm:$0xff] }
 0x112   : > { %1865 = vmatpush.msrb.mxu3 %v2252_v39  ;;  %v317_v39 = vld [vmem:[#allocation3 + $0x408] sm:$0xff] }
 0x113   : > { %853 = vperm.xlu0 %1924, %v388_v15   ;;  %v309_v15 = vld [vmem:[#allocation3 + $0x3c8] sm:$0xff] }
 0x114   : > { %1866 = vmatpush.msrb.mxu3 %v2270_v50  ;;  %v320_v50 = vld [vmem:[#allocation3 + $0x420] sm:$0xff] }
 0x115   : > { %1270 = vmatmul.f32.gmra.mxu1 %v192_v62  ;;  %v398_v62 = vld [vmem:[%s2762_s2 + $0x198] sm:$0xff] }
 0x116   : > { %1867 = vmatpush.msrb.mxu3 %v2285_v61  ;;  %v214_v61 = vld [vmem:[#allocation3 + $0xd0] sm:$0xff] }
 0x117   : > { %833 = vperm.xlu2 %1926, %v384_v42   ;;  %858 = vperm.xlu1 %1925, %v389_v43   ;;  %v649_v42 = vpop.permute.xlu0 %648  ;;  %v230_v43 = vld [vmem:[#allocation3 + $0x150] sm:$0xff] }
 0x118   : > { %1868 = vmatpush.msrb.mxu3 %v2301_v12  ;;  %1100 = vmatmul.f32.gmra.mxu0 %v197_v36  ;;  %v335_v12 = vld [vmem:[#allocation3 + $0x498] sm:$0xff] }
 0x119   : > { %1220 = vmatmul.f32.gmra.mxu3 %v317_v39  ;;  %1791 = vmatmul.msk.f32.gmra.mxu2 %vm911_vm3, %v205_v40  ;;  %v225_v39 = vld [vmem:[#allocation3 + $0x128] sm:$0xff]  ;;  %v396_v40 = vld [vmem:[%s2762_s2 + $0x188] sm:$0xff] }
 0x11a   : > { %1869 = vmatpush.msrb.mxu3 %v2304_v16  ;;  %v218_v16 = vld [vmem:[#allocation3 + $0xf0] sm:$0xff] }
 0x11b   : > { %868 = vperm.xlu0 %1924, %v391_v60   ;;  %v315_v60 = vld [vmem:[#allocation3 + $0x3f8] sm:$0xff] }
 0x11c   : > { %1870 = vmatpush.msrb.mxu3 %v621_v5  ;;  %v393_v5 = vld [vmem:[%s2762_s2 + $0x170] sm:$0xff] }
 0x11d   : > { %1273 = vmatmul.f32.gmra.mxu1 %v195_v41  ;;  %v2432_v41 = vpop.permute.xlu1 %653 }
 0x11e   : > { %1871 = vmatpush.msrb.mxu3 %v620_v27 }
 0x11f   : > { %848 = vperm.xlu2 %1926, %v387_v55   ;;  %v228_v55 = vld [vmem:[#allocation3 + $0x140] sm:$0xff] }
 0x120   : > { %1872 = vmatpush.msrb.mxu3 %v619_v29  ;;  %1103 = vmatmul.f32.gmra.mxu0 %v200_v47  ;;  %v341_v29 = vld [vmem:[#allocation3 + $0x4c8] sm:$0xff]  ;;  %v238_v47 = vld [vmem:[#allocation3 + $0x190] sm:$0xff] }
 0x121   : > { %1792 = vmatmul.msk.f32.gmra.mxu2 %vm911_vm3, %v208_v48  ;;  %1223 = vmatmul.f32.gmra.mxu3 %v320_v50  ;;  %v312_v48 = vld [vmem:[#allocation3 + $0x3e0] sm:$0xff] }
 0x122   : > { %1873 = vmatpush.msk.msra.mxu3 %vm1071_vm2, %v2105_v17  ;;  %v323_v17 = vld [vmem:[#allocation3 + $0x438] sm:$0xff] }
 0x123   : > { %883 = vperm.xlu0 %1924, %v394_v8  }
 0x124   : > { %1874 = vmatpush.msra.mxu3 %v2107_v18  ;;  %v201_v18 = vld [vmem:[#allocation3 + $0x68] sm:$0xff] }
 0x125   : > { %1276 = vmatmul.f32.gmra.mxu1 %v198_v51 }
 0x126   : > { %1875 = vmatpush.msra.mxu3 %v2112_v20  ;;  %v2379_v20 = vpop.permute.xlu2 %698 }
 0x127   : > { %863 = vperm.xlu2 %1926, %v390_v2   ;;  %v234_v2 = vld [vmem:[#allocation3 + $0x170] sm:$0xff] }
 0x128   : > { %1876 = vmatpush.msra.mxu3 %v2136_v38  ;;  %1106 = vmatmul.f32.gmra.mxu0 %v203_v58  ;;  %v206_v38 = vld [vmem:[#allocation3 + $0x90] sm:$0xff]  ;;  %v2437_v58 = vpop.permute.xlu1 %663 }
 0x129   : > { %1793 = vmatmul.msk.f32.gmra.mxu2 %vm911_vm3, %v211_v59  ;;  %1226 = vmatmul.f32.gmra.mxu3 %v323_v17  ;;  %v233_v59 = vld [vmem:[#allocation3 + $0x168] sm:$0xff] }
 0x12a   : > { %1877 = vmatpush.msra.mxu3 %v2147_v44  ;;  %v326_v44 = vld [vmem:[#allocation3 + $0x450] sm:$0xff]  ;;  %v241_v17 = vld [vmem:[#allocation3 + $0x1a8] sm:$0xff] }
 0x12b   : > { %898 = vperm.xlu0 %1924, %v397_v28   ;;  %v242_v28 = vld [vmem:[#allocation3 + $0x1b0] sm:$0xff] }
 0x12c   : > { %1878 = vmatpush.msra.mxu3 %v2165_v52  ;;  %v392_v52 = vld [vmem:[%s2762_s2 + $0x168] sm:$0xff] }
 0x12d   : > { %1279 = vmatmul.f32.gmra.mxu1 %v201_v18  ;;  %873 = vperm.xlu1 %1925, %v392_v52   ;;  %v2439_v18 = vpop.permute.xlu0 %673  ;;  %v236_v52 = vld [vmem:[#allocation3 + $0x180] sm:$0xff] }
 0x12e   : > { %1879 = vmatpush.msra.mxu3 %v2167_v53  ;;  %v2389_v53 = vpop.permute.xlu2 %713 }
 0x12f   : > { %878 = vperm.xlu2 %1926, %v393_v5  }
 0x130   : > { %1880 = vmatpush.msra.mxu3 %v2175_v56  ;;  %1109 = vmatmul.f32.gmra.mxu0 %v206_v38  ;;  %v209_v56 = vld [vmem:[#allocation3 + $0xa8] sm:$0xff] }
 0x131   : > { %1794 = vmatmul.msk.f32.gmra.mxu2 %vm911_vm3, %v214_v61  ;;  %1229 = vmatmul.f32.gmra.mxu3 %v326_v44  ;;  %v231_v61 = vld [vmem:[#allocation3 + $0x158] sm:$0xff] }
 0x132   : > { %1881 = vmatpush.msra.mxu3 %v2235_v30  ;;  %v207_v30 = vld [vmem:[#allocation3 + $0x98] sm:$0xff] }
 0x134   : > { %1882 = vmatpush.msra.mxu3 %v2249_v37  ;;  %v212_v37 = vld [vmem:[#allocation3 + $0xc0] sm:$0xff] }
 0x135   : > { %1282 = vmatmul.f32.gmra.mxu1 %v204_v63  ;;  %888 = vperm.xlu1 %1925, %v395_v14   ;;  %v321_v14 = vld [vmem:[#allocation3 + $0x428] sm:$0xff] }
 0x136   : > { %1883 = vmatpush.msra.mxu3 %v2267_v49  ;;  %v2396_v3 = vpop.permute.xlu2 %728  ;;  %v332_v49 = vld [vmem:[#allocation3 + $0x480] sm:$0xff] }
 0x137   : > { %893 = vperm.xlu2 %1926, %v396_v40  }
 0x138   : > { %1112 = vmatmul.f32.gmra.mxu0 %v209_v56  ;;  %v244_v56 = vld [vmem:[#allocation3 + $0x1c0] sm:$0xff] }
 0x139   : > { %1795 = vmatmul.msk.f32.gmra.mxu2 %vm911_vm3, %v217_v0  ;;  %1232 = vmatmul.f32.gmra.mxu3 %v329_v1  ;;  %v2444_v0 = vpop.permute.xlu1 %678  ;;  %v318_v1 = vld [vmem:[#allocation3 + $0x410] sm:$0xff] }
 0x13d   : > { %1285 = vmatmul.f32.gmra.mxu1 %v207_v30  ;;  %903 = vperm.xlu1 %1925, %v398_v62   ;;  %v2446_v30 = vpop.permute.xlu0 %688 }
 0x13e   : > { %v2402_v10 = vpop.permute.xlu2 %743 }
 0x140   : > { %1115 = vmatmul.f32.gmra.mxu0 %v212_v37 }
 0x141   : > { %1796 = vmatmul.msk.f32.gmra.mxu2 %vm911_vm3, %v220_v4  ;;  %1235 = vmatmul.f32.gmra.mxu3 %v332_v49  ;;  %v399_v4 = vld [vmem:[%s2762_s2 + $0x1a0] sm:$0xf] }
 0x142   : > { %908 = vperm.xlu2 %1926, %v399_v4  }
 0x145   : > { %1288 = vmatmul.f32.gmra.mxu1 %v210_v6 }
 0x146   : > { %v2408_v19 = vpop.permute.xlu2 %758 }
 0x148   : > { %1118 = vmatmul.f32.gmra.mxu0 %v215_v9  ;;  %v239_v9 = vld [vmem:[#allocation3 + $0x198] sm:$0xff] }
 0x149   : > { %1797 = vmatmul.msk.f32.gmra.mxu2 %vm911_vm3, %v223_v11  ;;  %1238 = vmatmul.f32.gmra.mxu3 %v335_v12  ;;  %v247_v12 = vld [vmem:[#allocation3 + $0x1d8] sm:$0xff] }
 0x14d   : > { %1291 = vmatmul.f32.gmra.mxu1 %v213_v13 }
 0x14e   : > { %v2414_v27 = vpop.permute.xlu2 %773 }
 0x150   : > { %1121 = vmatmul.f32.gmra.mxu0 %v218_v16  ;;  %v2454_v16 = vpop.permute.xlu1 %693 }
 0x151   : > { %1798 = vmatmul.msk.f32.gmra.mxu2 %vm911_vm3, %v226_v21  ;;  %1241 = vmatmul.f32.gmra.mxu3 %v338_v22  ;;  %v237_v22 = vld [vmem:[#allocation3 + $0x188] sm:$0xff] }
 0x155   : > { %1294 = vmatmul.f32.gmra.mxu1 %v216_v24  ;;  %v2458_v24 = vpop.permute.xlu0 %703 }
 0x156   : > { %v2420_v32 = vpop.permute.xlu2 %788 }
 0x158   : > { %1124 = vmatmul.f32.gmra.mxu0 %v221_v25 }
 0x159   : > { %1799 = vmatmul.msk.f32.gmra.mxu2 %vm911_vm3, %v229_v26  ;;  %1244 = vmatmul.f32.gmra.mxu3 %v341_v29 }
 0x15d   : > { %1297 = vmatmul.f32.gmra.mxu1 %v219_v23 }
 0x160   : > { %1127 = vmatmul.f32.gmra.mxu0 %v224_v31  ;;  %v250_v31 = vld [vmem:[#allocation3 + $0x1f0] sm:$0xff] }
 0x161   : > { %1800 = vmatmul.msk.f32.gmra.mxu2 %vm911_vm3, %v232_v45  ;;  %1247 = vmatmul.f32.gmra.mxu3 %v344_v54  ;;  %v2426_v36 = vpop.permute.xlu2 %803 }
 0x165   : > { %1300 = vmatmul.f32.gmra.mxu1 %v222_v33  ;;  %v324_v33 = vld [vmem:[#allocation3 + $0x440] sm:$0xff] }
 0x168   : > { %1130 = vmatmul.f32.gmra.mxu0 %v227_v34  ;;  %v240_v34 = vld [vmem:[#allocation3 + $0x1a0] sm:$0xff] }
 0x169   : > { %1801 = vmatmul.msk.f32.gmra.mxu2 %vm911_vm3, %v235_v7  ;;  %1387 = vmatmul.f32.vlgmr.msrb.gmra.mxu3 %v309_v15  ;;  %v2434_v50 = vpop.permute.xlu2 %818  ;;  %v2471_v7 = vpop.permute.xlu1 %708 }
 0x16d   : > { %1303 = vmatmul.f32.gmra.mxu1 %v225_v39 }
 0x170   : > { %1133 = vmatmul.f32.gmra.mxu0 %v230_v43  ;;  %v245_v43 = vld [vmem:[#allocation3 + $0x1c8] sm:$0xff] }
 0x171   : > { %1802 = vmatmul.msk.f32.gmra.mxu2 %vm911_vm3, %v238_v47  ;;  %1390 = vmatmul.f32.gmra.mxu3 %v312_v48  ;;  %v2441_v38 = vpop.permute.xlu2 %833  ;;  %v2475_v47 = vpop.permute.xlu0 %718  ;;  %v253_v48 = vld [vmem:[#allocation3 + $0x208] sm:$0xff] }
 0x172   : > { %v1444_v51 = vpop.f32.mrf.mxu2 }
 0x175   : > { %1306 = vmatmul.f32.gmra.mxu1 %v228_v55 }
 0x178   : > { %1136 = vmatmul.f32.gmra.mxu0 %v233_v59  ;;  %v327_v59 = vld [vmem:[#allocation3 + $0x458] sm:$0xff] }
 0x179   : > { %1803 = vmatmul.msk.f32.gmra.mxu2 %vm911_vm3, %v241_v17  ;;  %1393 = vmatmul.f32.gmra.mxu3 %v315_v60  ;;  %v849_v37 = vpop.permute.xlu2 %848  ;;  %v243_v60 = vld [vmem:[#allocation3 + $0x1b8] sm:$0xff] }
 0x17b   : > { %v1447_v44 = vpop.f32.mrf.mxu2 }
 0x17d   : > { %1309 = vmatmul.f32.gmra.mxu1 %v231_v61  ;;  %v1092_v63 = vpop.f32.mrf.mxu0 }
 0x17e   : > { %v1093_v13 = vadd.f32 %v1092_v63, %v649_v42 }
 0x180   : > { %1139 = vmatmul.f32.gmra.mxu0 %v236_v52 }
 0x181   : > { %1804 = vmatmul.msk.f32.gmra.mxu2 %vm911_vm3, %v244_v56  ;;  %1396 = vmatmul.f32.gmra.mxu3 %v318_v1  ;;  %v248_v1 = vld [vmem:[#allocation3 + $0x1e0] sm:$0xff] }
 0x184   : > { %v1212_v49 = vpop.f32.mrf.mxu3  ;;  %v1450_v6 = vpop.f32.mrf.mxu2 }
 0x185   : > { %1312 = vmatmul.f32.gmra.mxu1 %v234_v2  ;;  %v1095_v8 = vpop.f32.mrf.mxu0  ;;  %v2452_v11 = vadd.f32 %v1212_v49, %v849_v37  ;;  %v256_v2 = vld [vmem:[#allocation3 + $0x220] sm:$0xff]  ;;  %v330_v49 = vld [vmem:[#allocation3 + $0x470] sm:$0xff] }
 0x186   : > { %v1096_v45 = vadd.f32 %v1095_v8, %v2432_v41  ;;  %v2486_v8 = vpop.permute.xlu0 %733 }
 0x188   : > { %1142 = vmatmul.f32.gmra.mxu0 %v239_v9  ;;  %v246_v9 = vld [vmem:[#allocation3 + $0x1d0] sm:$0xff] }
 0x189   : > { %1805 = vmatmul.msk.f32.gmra.mxu2 %vm911_vm3, %v247_v12  ;;  %1399 = vmatmul.f32.gmra.mxu3 %v321_v14 }
 0x18a   : > { %v1268_v21 = vpop.f32.mrf.mxu1 }
 0x18b   : > { %v1269_v5 = vadd.f32 %v1268_v21, %v1093_v13 }
 0x18c   : > { %v2460_v25 = vpop.f32.mrf.mxu3  ;;  %v1453_v26 = vpop.f32.mrf.mxu2 }
 0x18d   : > { %v1445_v29 = vadd.f32 %v1444_v51, %v1269_v5  ;;  %1315 = vmatmul.f32.gmra.mxu1 %v237_v22  ;;  %v1098_v23 = vpop.f32.mrf.mxu0  ;;  %v251_v22 = vld [vmem:[#allocation3 + $0x1f8] sm:$0xff] }
 0x18e   : > { %v1099_v51 = vadd.f32 %v1098_v23, %v2344_v35  ;;  %v2483_v35 = vpop.permute.xlu1 %723  ;;  %v259_v5 = vld [vmem:[#allocation3 + $0x238] sm:$0xff] }
 0x18f   : > { %v1603_v54 = vmax.f32 %v1445_v29, 0.0 }
 0x190   : > { %1145 = vmatmul.f32.gmra.mxu0 %v242_v28  ;;  %v333_v28 = vld [vmem:[#allocation3 + $0x488] sm:$0xff] }
 0x191   : > { %1656 = vst.msk [vmem:[%s2465_s25] sm:$0xff] %vm403_vm0, %v1603_v54  ;;  %1806 = vmatmul.msk.f32.gmra.mxu2 %vm911_vm3, %v250_v31  ;;  %1402 = vmatmul.f32.gmra.mxu3 %v324_v33  ;;  %v249_v54 = vld [vmem:[#allocation3 + $0x1e8] sm:$0xff] }
 0x192   : > { %v1271_v62 = vpop.f32.mrf.mxu1 }
 0x193   : > { %v1272_v15 = vadd.f32 %v1271_v62, %v1096_v45  ;;  %v2499_v45 = vpop.permute.xlu0 %748 }
 0x194   : > { %v2473_v39 = vpop.f32.mrf.mxu3  ;;  %v1456_v40 = vpop.f32.mrf.mxu2 }
 0x195   : > { %v1448_v42 = vadd.f32 %v1447_v44, %v1272_v15  ;;  %1318 = vmatmul.f32.gmra.mxu1 %v240_v34  ;;  %v1101_v41 = vpop.f32.mrf.mxu0 }
 0x196   : > { %v1102_v37 = vadd.f32 %v1101_v41, %v2437_v58  ;;  %v2494_v31 = vpop.permute.xlu1 %738  ;;  %v262_v41 = vld [vmem:[#allocation3 + $0x250] sm:$0xff] }
 0x197   : > { %v1604_v55 = vmax.f32 %v1448_v42, 0.0  ;;  %v254_v42 = vld [vmem:[#allocation3 + $0x210] sm:$0xff] }
 0x198   : > { %1148 = vmatmul.f32.gmra.mxu0 %v245_v43 }
 0x199   : > { %1657 = vst.msk [vmem:[%s2465_s25 + $0x8] sm:$0xff] %vm403_vm0, %v1604_v55  ;;  %1807 = vmatmul.msk.f32.gmra.mxu2 %vm911_vm3, %v253_v48  ;;  %1405 = vmatmul.f32.gmra.mxu3 %v327_v59  ;;  %v252_v59 = vld [vmem:[#allocation3 + $0x200] sm:$0xff] }
 0x19a   : > { %v1274_v17 = vpop.f32.mrf.mxu1 }
 0x19b   : > { %v1275_v61 = vadd.f32 %v1274_v17, %v1099_v51  ;;  %v336_v51 = vld [vmem:[#allocation3 + $0x4a0] sm:$0xff] }
 0x19c   : > { %v2481_v44 = vpop.f32.mrf.mxu3  ;;  %v1459_v63 = vpop.f32.mrf.mxu2 }
 0x19d   : > { %v1451_v52 = vadd.f32 %v1450_v6, %v1275_v61  ;;  %1321 = vmatmul.f32.gmra.mxu1 %v243_v60  ;;  %v1104_v56 = vpop.f32.mrf.mxu0  ;;  %v2509_v60 = vpop.permute.xlu0 %763 }
 0x19e   : > { %v1105_v29 = vadd.f32 %v1104_v56, %v2360_v46  ;;  %v2507_v55 = vpop.permute.xlu1 %753 }
 0x19f   : > { %v1605_v4 = vmax.f32 %v1451_v52, 0.0 }
 0x1a0   : > { %1151 = vmatmul.f32.gmra.mxu0 %v248_v1  ;;  %v257_v1 = vld [vmem:[#allocation3 + $0x228] sm:$0xff] }
 0x1a1   : > { %1658 = vst.msk [vmem:[%s2465_s25 + $0x10] sm:$0xff] %vm403_vm0, %v1605_v4  ;;  %1808 = vmatmul.msk.f32.gmra.mxu2 %vm911_vm3, %v256_v2  ;;  %1408 = vmatmul.f32.gmra.mxu3 %v330_v49  ;;  %v265_v2 = vld [vmem:[#allocation3 + $0x268] sm:$0xff]  ;;  %v339_v49 = vld [vmem:[#allocation3 + $0x4b8] sm:$0xff] }
 0x1a2   : > { %v1277_v6 = vpop.f32.mrf.mxu1 }
 0x1a3   : > { %v1278_v12 = vadd.f32 %v1277_v6, %v1102_v37 }
 0x1a4   : > { %v1462_v13 = vpop.f32.mrf.mxu2  ;;  %v2491_v21 = vpop.f32.mrf.mxu3 }
 0x1a5   : > { %v1454_v14 = vadd.f32 %v1453_v26, %v1278_v12  ;;  %1324 = vmatmul.f32.gmra.mxu1 %v246_v9  ;;  %v1107_v58 = vpop.f32.mrf.mxu0  ;;  %v255_v9 = vld [vmem:[#allocation3 + $0x218] sm:$0xff] }
 0x1a6   : > { %v1108_v43 = vadd.f32 %v1107_v58, %v2439_v18  ;;  %v2517_v12 = vpop.permute.xlu1 %768 }
 0x1a7   : > { %v1606_v23 = vmax.f32 %v1454_v14, 0.0 }
 0x1a8   : > { %1154 = vmatmul.f32.gmra.mxu0 %v251_v22 }
 0x1a9   : > { %1659 = vst.msk [vmem:[%s2465_s25 + $0x18] sm:$0xff] %vm403_vm0, %v1606_v23  ;;  %1809 = vmatmul.msk.f32.gmra.mxu2 %vm911_vm3, %v259_v5  ;;  %1411 = vmatmul.f32.gmra.mxu3 %v333_v28  ;;  %v260_v5 = vld [vmem:[#allocation3 + $0x240] sm:$0xff] }
 0x1aa   : > { %v1280_v26 = vpop.f32.mrf.mxu1  ;;  %v268_v23 = vld [vmem:[#allocation3 + $0x280] sm:$0xff] }
 0x1ab   : > { %v1281_v33 = vadd.f32 %v1280_v26, %v1105_v29  ;;  %v2521_v29 = vpop.permute.xlu0 %778 }
 0x1ac   : > { %v1465_v62 = vpop.f32.mrf.mxu2  ;;  %v2501_v15 = vpop.f32.mrf.mxu3 }
 0x1ad   : > { %v1457_v34 = vadd.f32 %v1456_v40, %v1281_v33  ;;  %1327 = vmatmul.f32.gmra.mxu1 %v249_v54  ;;  %v1110_v46 = vpop.f32.mrf.mxu0  ;;  %v342_v54 = vld [vmem:[#allocation3 + $0x4d0] sm:$0xff] }
 0x1ae   : > { %v1111_v37 = vadd.f32 %v1110_v46, %v2444_v0 }
 0x1af   : > { %v1607_v48 = vmax.f32 %v1457_v34, 0.0 }
 0x1b0   : > { %1157 = vmatmul.f32.gmra.mxu0 %v254_v42 }
 0x1b1   : > { %1660 = vst.msk [vmem:[%s2465_s25 + $0x20] sm:$0xff] %vm403_vm0, %v1607_v48  ;;  %1810 = vmatmul.msk.f32.gmra.mxu2 %vm911_vm3, %v262_v41  ;;  %1414 = vmatmul.f32.gmra.mxu3 %v336_v51  ;;  %v263_v48 = vld [vmem:[#allocation3 + $0x258] sm:$0xff] }
 0x1b2   : > { %v1283_v40 = vpop.f32.mrf.mxu1  ;;  %v271_v51 = vld [vmem:[#allocation3 + $0x298] sm:$0xff] }
 0x1b3   : > { %v1284_v17 = vadd.f32 %v1283_v40, %v1108_v43 }
 0x1b4   : > { %v1468_v61 = vpop.f32.mrf.mxu2  ;;  %v2511_v56 = vpop.f32.mrf.mxu3 }
 0x1b5   : > { %v1460_v52 = vadd.f32 %v1459_v63, %v1284_v17  ;;  %1330 = vmatmul.f32.gmra.mxu1 %v252_v59  ;;  %v1113_v18 = vpop.f32.mrf.mxu0  ;;  %v345_v17 = vld [vmem:[#allocation3 + $0x4e8] sm:$0xf] }
 0x1b6   : > { %v1114_v28 = vadd.f32 %v1113_v18, %v2369_v57  ;;  %v2529_v57 = vpop.permute.xlu1 %783  ;;  %v261_v18 = vld [vmem:[#allocation3 + $0x248] sm:$0xff] }
 0x1b7   : > { %v1608_v4 = vmax.f32 %v1460_v52, 0.0  ;;  %v2532_v52 = vpop.permute.xlu0 %793 }
 0x1b8   : > { %1160 = vmatmul.f32.gmra.mxu0 %v257_v1 }
 0x1b9   : > { %1661 = vst.msk [vmem:[%s2465_s25 + $0x28] sm:$0xff] %vm403_vm0, %v1608_v4  ;;  %1811 = vmatmul.msk.f32.gmra.mxu2 %vm911_vm3, %v265_v2  ;;  %1417 = vmatmul.f32.gmra.mxu3 %v339_v49  ;;  %v266_v49 = vld [vmem:[#allocation3 + $0x270] sm:$0xff] }
 0x1ba   : > { %v1286_v6 = vpop.f32.mrf.mxu1 }
 0x1bb   : > { %v1287_v63 = vadd.f32 %v1286_v6, %v1111_v37  ;;  %v274_v6 = vld [vmem:[#allocation3 + $0x2b0] sm:$0xff] }
 0x1bc   : > { %v1471_v14 = vpop.f32.mrf.mxu2  ;;  %v2519_v22 = vpop.f32.mrf.mxu3 }
 0x1bd   : > { %v1463_v58 = vadd.f32 %v1462_v13, %v1287_v63  ;;  %1333 = vmatmul.f32.gmra.mxu1 %v255_v9  ;;  %v1116_v0 = vpop.f32.mrf.mxu0  ;;  %v258_v13 = vld [vmem:[#allocation3 + $0x230] sm:$0xff] }
 0x1be   : > { %v1117_v40 = vadd.f32 %v1116_v0, %v2446_v30  ;;  %v2540_v0 = vpop.permute.xlu1 %798 }
 0x1bf   : > { %v1609_v26 = vmax.f32 %v1463_v58, 0.0  ;;  %v313_v58 = vld [vmem:[#allocation3 + $0x3e8] sm:$0xff] }
 0x1c0   : > { %1163 = vmatmul.f32.gmra.mxu0 %v260_v5  ;;  %v2545_v5 = vpop.permute.xlu0 %808 }
 0x1c1   : > { %1662 = vst.msk [vmem:[%s2465_s25 + $0x30] sm:$0xff] %vm403_vm0, %v1609_v26  ;;  %1812 = vmatmul.msk.f32.gmra.mxu2 %vm911_vm3, %v268_v23  ;;  %1420 = vmatmul.f32.gmra.mxu3 %v342_v54  ;;  %v264_v23 = vld [vmem:[#allocation3 + $0x260] sm:$0xff] }
 0x1c2   : > { %v1289_v33 = vpop.f32.mrf.mxu1 }
 0x1c3   : > { %v1290_v34 = vadd.f32 %v1289_v33, %v1114_v28 }
 0x1c4   : > { %v1474_v46 = vpop.f32.mrf.mxu2  ;;  %v2527_v41 = vpop.f32.mrf.mxu3 }
 0x1c5   : > { %v1466_v42 = vadd.f32 %v1465_v62, %v1290_v34  ;;  %1336 = vmatmul.f32.gmra.mxu1 %v258_v13  ;;  %v1119_v43 = vpop.f32.mrf.mxu0  ;;  %v269_v13 = vld [vmem:[#allocation3 + $0x288] sm:$0xff] }
 0x1c6   : > { %v1120_v9 = vadd.f32 %v1119_v43, %v2454_v16  ;;  %v277_v34 = vld [vmem:[#allocation3 + $0x2c8] sm:$0xff] }
 0x1c7   : > { %v1610_v59 = vmax.f32 %v1466_v42, 0.0 }
 0x1c8   : > { %1166 = vmatmul.f32.gmra.mxu0 %v263_v48  ;;  %v316_v48 = vld [vmem:[#allocation3 + $0x400] sm:$0xff] }
 0x1c9   : > { %1663 = vst.msk [vmem:[%s2465_s25 + $0x38] sm:$0xff] %vm403_vm0, %v1610_v59  ;;  %1813 = vmatmul.msk.f32.gmra.mxu2 %vm911_vm3, %v271_v51  ;;  %1423 = vmatmul.f32.gmra.mxu3 %v345_v17  ;;  %v2554_v51 = vpop.permute.xlu1 %813  ;;  %v2557_v17 = vpop.permute.xlu0 %823 }
 0x1ca   : > { %v1292_v62 = vpop.f32.mrf.mxu1 }
 0x1cb   : > { %v1293_v1 = vadd.f32 %v1292_v62, %v1117_v40  ;;  %v267_v40 = vld [vmem:[#allocation3 + $0x278] sm:$0xff] }
 0x1cc   : > { %v1477_v2 = vpop.f32.mrf.mxu2  ;;  %v2537_v4 = vpop.f32.mrf.mxu3 }
 0x1cd   : > { %v1469_v37 = vadd.f32 %v1468_v61, %v1293_v1  ;;  %1339 = vmatmul.f32.gmra.mxu1 %v261_v18  ;;  %v1122_v30 = vpop.f32.mrf.mxu0 }
 0x1ce   : > { %v1123_v42 = vadd.f32 %v1122_v30, %v2379_v20  ;;  %v280_v30 = vld [vmem:[#allocation3 + $0x2e0] sm:$0xff] }
 0x1cf   : > { %v1611_v63 = vmax.f32 %v1469_v37, 0.0  ;;  %v272_v37 = vld [vmem:[#allocation3 + $0x2a0] sm:$0xff] }
 0x1d0   : > { %1169 = vmatmul.f32.gmra.mxu0 %v266_v49 }
 0x1d1   : > { %1664 = vst.msk [vmem:[%s2465_s25 + $0x40] sm:$0xff] %vm403_vm0, %v1611_v63  ;;  %1814 = vmatmul.msk.f32.gmra.mxu2 %vm911_vm3, %v274_v6  ;;  %1827 = vmatmul.msk.f32.vlgmr.msra.gmra.mxu3 %vm911_vm3, %v313_v58 }
 0x1d2   : > { %v1295_v61 = vpop.f32.mrf.mxu1 }
 0x1d3   : > { %v1296_v28 = vadd.f32 %v1295_v61, %v1120_v9  ;;  %v319_v9 = vld [vmem:[#allocation3 + $0x418] sm:$0xff]  ;;  %v2566_v61 = vpop.permute.xlu1 %828 }
 0x1d4   : > { %v1480_v26 = vpop.f32.mrf.mxu2  ;;  %v2548_v16 = vpop.f32.mrf.mxu3 }
 0x1d5   : > { %v1472_v54 = vadd.f32 %v1471_v14, %v1296_v28  ;;  %1342 = vmatmul.f32.gmra.mxu1 %v264_v23  ;;  %v1125_v33 = vpop.f32.mrf.mxu0 }
 0x1d6   : > { %v1126_v49 = vadd.f32 %v1125_v33, %v2458_v24  ;;  %v275_v33 = vld [vmem:[#allocation3 + $0x2b8] sm:$0xff] }
 0x1d7   : > { %v1612_v43 = vmax.f32 %v1472_v54, 0.0 }
 0x1d8   : > { %1172 = vmatmul.f32.gmra.mxu0 %v269_v13  ;;  %v283_v13 = vld [vmem:[#allocation3 + $0x2f8] sm:$0xff] }
 0x1d9   : > { %1665 = vst.msk [vmem:[%s2465_s25 + $0x48] sm:$0xff] %vm403_vm0, %v1612_v43  ;;  %1815 = vmatmul.msk.f32.gmra.mxu2 %vm911_vm3, %v277_v34  ;;  %1828 = vmatmul.msk.f32.gmra.mxu3 %vm911_vm3, %v316_v48  ;;  %v2570_v34 = vpop.permute.xlu0 %838  ;;  %v322_v48 = vld [vmem:[#allocation3 + $0x430] sm:$0xff] }
 0x1da   : > { %v1298_v14 = vpop.f32.mrf.mxu1 }
 0x1db   : > { %v1299_v59 = vadd.f32 %v1298_v14, %v1123_v42  ;;  %v273_v14 = vld [vmem:[#allocation3 + $0x2a8] sm:$0xff] }
 0x1dc   : > { %v1483_v62 = vpop.f32.mrf.mxu2  ;;  %v2559_v20 = vpop.f32.mrf.mxu3 }
 0x1dd   : > { %v1475_v18 = vadd.f32 %v1474_v46, %v1299_v59  ;;  %1345 = vmatmul.f32.gmra.mxu1 %v267_v40  ;;  %v1128_v1 = vpop.f32.mrf.mxu0  ;;  %v270_v46 = vld [vmem:[#allocation3 + $0x290] sm:$0xff] }
 0x1de   : > { %v1129_v42 = vadd.f32 %v1128_v1, %v2471_v7  ;;  %v286_v1 = vld [vmem:[#allocation3 + $0x310] sm:$0xff] }
 0x1df   : > { %v1613_v6 = vmax.f32 %v1475_v18, 0.0 }
 0x1e0   : > { %1175 = vmatmul.f32.gmra.mxu0 %v272_v37 }
 0x1e1   : > { %1666 = vst.msk [vmem:[%s2465_s25 + $0x50] sm:$0xff] %vm403_vm0, %v1613_v6  ;;  %1816 = vmatmul.msk.f32.gmra.mxu2 %vm911_vm3, %v280_v30  ;;  %1829 = vmatmul.msk.f32.gmra.mxu3 %vm911_vm3, %v319_v9  ;;  %v2580_v6 = vpop.permute.xlu1 %843 }
 0x1e2   : > { %v1301_v63 = vpop.f32.mrf.mxu1 }
 0x1e3   : > { %v1302_v58 = vadd.f32 %v1301_v63, %v1126_v49  ;;  %v278_v49 = vld [vmem:[#allocation3 + $0x2d0] sm:$0xff] }
 0x1e4   : > { %v1486_v23 = vpop.f32.mrf.mxu2  ;;  %v2568_v54 = vpop.f32.mrf.mxu3 }
 0x1e5   : > { %v1478_v28 = vadd.f32 %v1477_v2, %v1302_v58  ;;  %1348 = vmatmul.f32.gmra.mxu1 %v270_v46  ;;  %v1131_v24 = vpop.f32.mrf.mxu0  ;;  %v325_v46 = vld [vmem:[#allocation3 + $0x448] sm:$0xff]  ;;  %v854_v58 = vpop.permute.xlu0 %853 }
 0x1e6   : > { %v1132_v9 = vadd.f32 %v1131_v24, %v2389_v53  ;;  %v281_v24 = vld [vmem:[#allocation3 + $0x2e8] sm:$0xff] }
 0x1e7   : > { %v1614_v43 = vmax.f32 %v1478_v28, 0.0  ;;  %v276_v28 = vld [vmem:[#allocation3 + $0x2c0] sm:$0xff] }
 0x1e8   : > { %1178 = vmatmul.f32.gmra.mxu0 %v275_v33  ;;  %v1216_v33 = vadd.f32 %v2460_v25, %v854_v58 }
 0x1e9   : > { %1667 = vst.msk [vmem:[%s2465_s25 + $0x58] sm:$0xff] %vm403_vm0, %v1614_v43  ;;  %1817 = vmatmul.msk.f32.gmra.mxu2 %vm911_vm3, %v283_v13  ;;  %1830 = vmatmul.msk.f32.gmra.mxu3 %vm911_vm3, %v322_v48 }
 0x1ea   : > { %v1304_v2 = vpop.f32.mrf.mxu1 }
 0x1eb   : > { %v1305_v40 = vadd.f32 %v1304_v2, %v1129_v42  ;;  %v289_v2 = vld [vmem:[#allocation3 + $0x328] sm:$0xff] }
 0x1ec   : > { %v1489_v59 = vpop.f32.mrf.mxu2  ;;  %v1388_v37 = vpop.f32.mrf.mxu3 }
 0x1ed   : > { %v1481_v18 = vadd.f32 %v1480_v26, %v1305_v40  ;;  %1351 = vmatmul.f32.gmra.mxu1 %v273_v14  ;;  %v1134_v30 = vpop.f32.mrf.mxu0  ;;  %v2578_v7 = vadd.f32 %v1388_v37, %v2452_v11  ;;  %v859_v37 = vpop.permute.xlu1 %858 }
 0x1ee   : > { %v1135_v14 = vadd.f32 %v1134_v30, %v2475_v47  ;;  %v284_v30 = vld [vmem:[#allocation3 + $0x300] sm:$0xff] }
 0x1ef   : > { %v1615_v63 = vmax.f32 %v1481_v18, 0.0  ;;  %v328_v18 = vld [vmem:[#allocation3 + $0x460] sm:$0xff] }
 0x1f0   : > { %1181 = vmatmul.f32.gmra.mxu0 %v278_v49 }
 0x1f1   : > { %1668 = vst.msk [vmem:[%s2465_s25 + $0x60] sm:$0xff] %vm403_vm0, %v1615_v63  ;;  %1818 = vmatmul.msk.f32.gmra.mxu2 %vm911_vm3, %v286_v1  ;;  %1831 = vmatmul.msk.f32.gmra.mxu3 %vm911_vm3, %v325_v46  ;;  %v1219_v1 = vadd.f32 %v2473_v39, %v859_v37  ;;  %v295_v37 = vld [vmem:[#allocation3 + $0x358] sm:$0xff] }
 0x1f2   : > { %v1307_v26 = vpop.f32.mrf.mxu1 }
 0x1f3   : > { %v1308_v11 = vadd.f32 %v1307_v26, %v1132_v9  ;;  %v292_v26 = vld [vmem:[#allocation3 + $0x340] sm:$0xff] }
 0x1f4   : > { %v1492_v13 = vpop.f32.mrf.mxu2  ;;  %v1391_v43 = vpop.f32.mrf.mxu3 }
 0x1f5   : > { %v1484_v42 = vadd.f32 %v1483_v62, %v1308_v11  ;;  %1354 = vmatmul.f32.gmra.mxu1 %v276_v28  ;;  %v1137_v53 = vpop.f32.mrf.mxu0  ;;  %v2588_v48 = vadd.f32 %v1391_v43, %v1216_v33  ;;  %v279_v62 = vld [vmem:[#allocation3 + $0x2d8] sm:$0xff] }
 0x1f6   : > { %v1138_v28 = vadd.f32 %v1137_v53, %v2483_v35  ;;  %v331_v33 = vld [vmem:[#allocation3 + $0x478] sm:$0xff] }
 0x1f7   : > { %v1616_v40 = vmax.f32 %v1484_v42, 0.0  ;;  %v864_v42 = vpop.permute.xlu2 %863  ;;  %v287_v53 = vld [vmem:[#allocation3 + $0x318] sm:$0xff] }
 0x1f8   : > { %1184 = vmatmul.f32.gmra.mxu0 %v281_v24  ;;  %v1222_v24 = vadd.f32 %v2481_v44, %v864_v42 }
 0x1f9   : > { %1669 = vst.msk [vmem:[%s2465_s25 + $0x68] sm:$0xff] %vm403_vm0, %v1616_v40  ;;  %1819 = vmatmul.msk.f32.gmra.mxu2 %vm911_vm3, %v289_v2  ;;  %1832 = vmatmul.msk.f32.gmra.mxu3 %vm911_vm3, %v328_v18 }
 0x1fa   : > { %v1310_v25 = vpop.f32.mrf.mxu1 }
 0x1fb   : > { %v1311_v49 = vadd.f32 %v1310_v25, %v1135_v14 }
 0x1fc   : > { %v1495_v9 = vpop.f32.mrf.mxu2  ;;  %v1394_v46 = vpop.f32.mrf.mxu3 }
 0x1fd   : > { %v1487_v63 = vadd.f32 %v1486_v23, %v1311_v49  ;;  %1357 = vmatmul.f32.gmra.mxu1 %v279_v62  ;;  %v1140_v47 = vpop.f32.mrf.mxu0  ;;  %v2596_v58 = vadd.f32 %v1394_v46, %v1219_v1  ;;  %v282_v23 = vld [vmem:[#allocation3 + $0x2f0] sm:$0xff]  ;;  %v869_v1 = vpop.permute.xlu0 %868 }
 0x1fe   : > { %v1141_v25 = vadd.f32 %v1140_v47, %v2396_v3  ;;  %v334_v49 = vld [vmem:[#allocation3 + $0x490] sm:$0xff]  ;;  %v1225_v46 = vadd.f32 %v2491_v21, %v869_v1 }
 0x1ff   : > { %v1617_v11 = vmax.f32 %v1487_v63, 0.0  ;;  %v290_v47 = vld [vmem:[#allocation3 + $0x330] sm:$0xff] }
 0x200   : > { %1187 = vmatmul.f32.gmra.mxu0 %v284_v30 }
 0x201   : > { %1670 = vst.msk [vmem:[%s2465_s25 + $0x70] sm:$0xff] %vm403_vm0, %v1617_v11  ;;  %1820 = vmatmul.msk.f32.gmra.mxu2 %vm911_vm3, %v292_v26  ;;  %1833 = vmatmul.msk.f32.gmra.mxu3 %vm911_vm3, %v331_v33  ;;  %v298_v33 = vld [vmem:[#allocation3 + $0x370] sm:$0xff] }
 0x202   : > { %v1313_v39 = vpop.f32.mrf.mxu1 }
 0x203   : > { %v1314_v43 = vadd.f32 %v1313_v39, %v1138_v28 }
 0x204   : > { %v1498_v2 = vpop.f32.mrf.mxu2  ;;  %v1397_v40 = vpop.f32.mrf.mxu3 }
 0x205   : > { %v1490_v14 = vadd.f32 %v1489_v59, %v1314_v43  ;;  %1360 = vmatmul.f32.gmra.mxu1 %v282_v23  ;;  %v1143_v35 = vpop.f32.mrf.mxu0  ;;  %v2604_v18 = vadd.f32 %v1397_v40, %v1222_v24  ;;  %v285_v59 = vld [vmem:[#allocation3 + $0x308] sm:$0xff]  ;;  %v874_v43 = vpop.permute.xlu1 %873 }
 0x206   : > { %v1144_v42 = vadd.f32 %v1143_v35, %v2486_v8  ;;  %v337_v23 = vld [vmem:[#allocation3 + $0x4a8] sm:$0xff] }
 0x207   : > { %v1618_v62 = vmax.f32 %v1490_v14, 0.0  ;;  %v1228_v14 = vadd.f32 %v2501_v15, %v874_v43  ;;  %v293_v35 = vld [vmem:[#allocation3 + $0x348] sm:$0xff]  ;;  %v343_v43 = vld [vmem:[#allocation3 + $0x4d8] sm:$0xff] }
 0x208   : > { %1190 = vmatmul.f32.gmra.mxu0 %v287_v53 }
 0x209   : > { %1671 = vst.msk [vmem:[%s2465_s25 + $0x78] sm:$0xff] %vm403_vm0, %v1618_v62  ;;  %1821 = vmatmul.msk.f32.gmra.mxu2 %vm911_vm3, %v295_v37  ;;  %1834 = vmatmul.msk.f32.gmra.mxu3 %vm911_vm3, %v334_v49  ;;  %v301_v62 = vld [vmem:[#allocation3 + $0x388] sm:$0xff] }
 0x20a   : > { %v1316_v44 = vpop.f32.mrf.mxu1 }
 0x20b   : > { %v1317_v63 = vadd.f32 %v1316_v44, %v1141_v25  ;;  %v340_v44 = vld [vmem:[#allocation3 + $0x4c0] sm:$0xff] }
 0x20c   : > { %v1501_v30 = vpop.f32.mrf.mxu2  ;;  %v1400_v28 = vpop.f32.mrf.mxu3 }
 0x20d   : > { %v1493_v26 = vadd.f32 %v1492_v13, %v1317_v63  ;;  %1363 = vmatmul.f32.gmra.mxu1 %v285_v59  ;;  %v1146_v3 = vpop.f32.mrf.mxu0  ;;  %v2612_v11 = vadd.f32 %v1400_v28, %v1225_v46  ;;  %v288_v13 = vld [vmem:[#allocation3 + $0x320] sm:$0xff]  ;;  %v879_v59 = vpop.permute.xlu2 %878 }
 0x20e   : > { %v1147_v49 = vadd.f32 %v1146_v3, %v2494_v31  ;;  %v1231_v46 = vadd.f32 %v2511_v56, %v879_v59  ;;  %v296_v3 = vld [vmem:[#allocation3 + $0x360] sm:$0xff]  ;;  %v889_v59 = vpop.permute.xlu1 %888 }
 0x20f   : > { %v1619_v39 = vmax.f32 %v1493_v26, 0.0 }
 0x210   : > { %1193 = vmatmul.f32.gmra.mxu0 %v290_v47 }
 0x211   : > { %1672 = vst.msk [vmem:[%s2465_s25 + $0x80] sm:$0xff] %vm403_vm0, %v1619_v39  ;;  %1822 = vmatmul.msk.f32.gmra.mxu2 %vm911_vm3, %v298_v33  ;;  %1835 = vmatmul.msk.f32.gmra.mxu3 %vm911_vm3, %v337_v23 }
 0x212   : > { %v1319_v21 = vpop.f32.mrf.mxu1 }
 0x213   : > { %v1320_v24 = vadd.f32 %v1319_v21, %v1144_v42  ;;  %v304_v42 = vld [vmem:[#allocation3 + $0x3a0] sm:$0xff]  ;;  %v884_v21 = vpop.permute.xlu0 %883 }
 0x214   : > { %v1504_v40 = vpop.f32.mrf.mxu2  ;;  %v1403_v37 = vpop.f32.mrf.mxu3 }
 0x215   : > { %v1496_v53 = vadd.f32 %v1495_v9, %v1320_v24  ;;  %1366 = vmatmul.f32.gmra.mxu1 %v288_v13  ;;  %v1149_v8 = vpop.f32.mrf.mxu0  ;;  %v2620_v25 = vadd.f32 %v1403_v37, %v1228_v14  ;;  %v291_v9 = vld [vmem:[#allocation3 + $0x338] sm:$0xff]  ;;  %v1234_v24 = vadd.f32 %v2519_v22, %v884_v21 }
 0x216   : > { %v1150_v39 = vadd.f32 %v1149_v8, %v2402_v10  ;;  %v299_v8 = vld [vmem:[#allocation3 + $0x378] sm:$0xff] }
 0x217   : > { %v1620_v1 = vmax.f32 %v1496_v53, 0.0 }
 0x218   : > { %1196 = vmatmul.f32.gmra.mxu0 %v293_v35 }
 0x219   : > { %1673 = vst.msk [vmem:[%s2465_s25 + $0x88] sm:$0xff] %vm403_vm0, %v1620_v1  ;;  %1823 = vmatmul.msk.f32.gmra.mxu2 %vm911_vm3, %v301_v62  ;;  %1836 = vmatmul.msk.f32.gmra.mxu3 %vm911_vm3, %v340_v44  ;;  %v307_v62 = vld [vmem:[#allocation3 + $0x3b8] sm:$0xff]  ;;  %v346_v44 = vld [vmem:[#allocation3 + $0x4f0] sm:$0xf] }
 0x21a   : > { %v1322_v15 = vpop.f32.mrf.mxu1 }
 0x21b   : > { %v1323_v63 = vadd.f32 %v1322_v15, %v1147_v49 }
 0x21c   : > { %v1507_v26 = vpop.f32.mrf.mxu2  ;;  %v1406_v47 = vpop.f32.mrf.mxu3 }
 0x21d   : > { %v1499_v28 = vadd.f32 %v1498_v2, %v1323_v63  ;;  %1369 = vmatmul.f32.gmra.mxu1 %v291_v9  ;;  %v1152_v31 = vpop.f32.mrf.mxu0  ;;  %v2628_v33 = vadd.f32 %v1406_v47, %v1231_v46  ;;  %v294_v2 = vld [vmem:[#allocation3 + $0x350] sm:$0xff]  ;;  %v1237_v9 = vadd.f32 %v2527_v41, %v889_v59 }
 0x21e   : > { %v1153_v49 = vadd.f32 %v1152_v31, %v2499_v45  ;;  %v302_v47 = vld [vmem:[#allocation3 + $0x390] sm:$0xff] }
 0x21f   : > { %v1621_v23 = vmax.f32 %v1499_v28, 0.0 }
 0x220   : > { %1199 = vmatmul.f32.gmra.mxu0 %v296_v3  ;;  %v310_v3 = vld [vmem:[#allocation3 + $0x3d0] sm:$0xff] }
 0x221   : > { %1674 = vst.msk [vmem:[%s2465_s25 + $0x90] sm:$0xff] %vm403_vm0, %v1621_v23  ;;  %1824 = vmatmul.msk.f32.gmra.mxu2 %vm911_vm3, %v304_v42  ;;  %1837 = vmatmul.msk.f32.gmra.mxu3 %vm911_vm3, %v343_v43  ;;  %v894_v23 = vpop.permute.xlu2 %893  ;;  %v300_v43 = vld [vmem:[#allocation3 + $0x380] sm:$0xff] }
 0x222   : > { %v1325_v56 = vpop.f32.mrf.mxu1  ;;  %v1240_v21 = vadd.f32 %v2537_v4, %v894_v23 }
 0x223   : > { %v1326_v13 = vadd.f32 %v1325_v56, %v1150_v39 }
 0x224   : > { %v1510_v14 = vpop.f32.mrf.mxu2  ;;  %v1409_v37 = vpop.f32.mrf.mxu3 }
 0x225   : > { %v1502_v53 = vadd.f32 %v1501_v30, %v1326_v13  ;;  %1372 = vmatmul.f32.gmra.mxu1 %v294_v2  ;;  %v1155_v10 = vpop.f32.mrf.mxu0  ;;  %v2636_v35 = vadd.f32 %v1409_v37, %v1234_v24  ;;  %v297_v30 = vld [vmem:[#allocation3 + $0x368] sm:$0xff] }
 0x226   : > { %v1156_v42 = vadd.f32 %v1155_v10, %v2507_v55 }
 0x227   : > { %v1622_v1 = vmax.f32 %v1502_v53, 0.0  ;;  %v305_v53 = vld [vmem:[#allocation3 + $0x3a8] sm:$0xff] }
 0x228   : > { %1202 = vmatmul.f32.gmra.mxu0 %v299_v8  ;;  %v899_v8 = vpop.permute.xlu0 %898 }
 0x229   : > { %1675 = vst.msk [vmem:[%s2465_s25 + $0x98] sm:$0xff] %vm403_vm0, %v1622_v1  ;;  %1825 = vmatmul.msk.f32.gmra.mxu2 %vm911_vm3, %v307_v62  ;;  %1838 = vmatmul.msk.f32.gmra.mxu3 %vm911_vm3, %v346_v44  ;;  %v1243_v4 = vadd.f32 %v2548_v16, %v899_v8 }
 0x22a   : > { %v1328_v22 = vpop.f32.mrf.mxu1 }
 0x22b   : > { %v1329_v15 = vadd.f32 %v1328_v22, %v1153_v49  ;;  %v303_v49 = vld [vmem:[#allocation3 + $0x398] sm:$0xff] }
 0x22c   : > { %v1513_v63 = vpop.f32.mrf.mxu2  ;;  %v1412_v28 = vpop.f32.mrf.mxu3 }
 0x22d   : > { %v1505_v46 = vadd.f32 %v1504_v40, %v1329_v15  ;;  %1375 = vmatmul.f32.gmra.mxu1 %v297_v30  ;;  %v1158_v45 = vpop.f32.mrf.mxu0  ;;  %v2644_v31 = vadd.f32 %v1412_v28, %v1237_v9  ;;  %v904_v9 = vpop.permute.xlu1 %903  ;;  %v306_v28 = vld [vmem:[#allocation3 + $0x3b0] sm:$0xff] }
 0x22e   : > { %v1159_v37 = vadd.f32 %v1158_v45, %v2408_v19 }
 0x22f   : > { %v1623_v39 = vmax.f32 %v1505_v46, 0.0 }
 0x230   : > { %1205 = vmatmul.f32.gmra.mxu0 %v302_v47  ;;  %v1246_v47 = vadd.f32 %v2559_v20, %v904_v9 }
 0x231   : > { %1676 = vst.msk [vmem:[%s2465_s25 + $0xa0] sm:$0xff] %vm403_vm0, %v1623_v39  ;;  %1826 = vmatmul.msk.f32.gmra.mxu2 %vm911_vm3, %v310_v3 }
 0x232   : > { %v1331_v41 = vpop.f32.mrf.mxu1 }
 0x233   : > { %v1332_v40 = vadd.f32 %v1331_v41, %v1156_v42 }
 0x234   : > { %v1516_v56 = vpop.f32.mrf.mxu2  ;;  %v1415_v13 = vpop.f32.mrf.mxu3 }
 0x235   : > { %v1508_v2 = vadd.f32 %v1507_v26, %v1332_v40  ;;  %1378 = vmatmul.f32.gmra.mxu1 %v300_v43  ;;  %v1161_v24 = vpop.f32.mrf.mxu0  ;;  %v2651_v55 = vadd.f32 %v1415_v13, %v1240_v21 }
 0x236   : > { %v1162_v19 = vadd.f32 %v1161_v24, %v2509_v60  ;;  %v909_v60 = vpop.permute.xlu2 %908 }
 0x237   : > { %v1624_v10 = vmax.f32 %v1508_v2, 0.0  ;;  %v1249_v21 = vadd.f32 %v2568_v54, %v909_v60 }
 0x238   : > { %1208 = vmatmul.f32.gmra.mxu0 %v305_v53 }
 0x239   : > { %1677 = vst.msk [vmem:[%s2465_s25 + $0xa8] sm:$0xff] %vm403_vm0, %v1624_v10 }
 0x23a   : > { %v1334_v62 = vpop.f32.mrf.mxu1 }
 0x23b   : > { %v1335_v1 = vadd.f32 %v1334_v62, %v1159_v37 }
 0x23c   : > { %v1519_v26 = vpop.f32.mrf.mxu2  ;;  %v1418_v59 = vpop.f32.mrf.mxu3 }
 0x23d   : > { %v1511_v44 = vadd.f32 %v1510_v14, %v1335_v1  ;;  %1381 = vmatmul.f32.gmra.mxu1 %v303_v49  ;;  %v1164_v22 = vpop.f32.mrf.mxu0  ;;  %v2657_v30 = vadd.f32 %v1418_v59, %v1243_v4 }
 0x23e   : > { %v1165_v41 = vadd.f32 %v1164_v22, %v2517_v12 }
 0x23f   : > { %v1625_v15 = vmax.f32 %v1511_v44, 0.0 }
 0x241   : > { %1678 = vst.msk [vmem:[%s2465_s25 + $0xb0] sm:$0xff] %vm403_vm0, %v1625_v15 }
 0x242   : > { %v1337_v46 = vpop.f32.mrf.mxu1 }
 0x243   : > { %v1338_v45 = vadd.f32 %v1337_v46, %v1162_v19 }
 0x244   : > { %v1522_v16 = vpop.f32.mrf.mxu2  ;;  %v1421_v14 = vpop.f32.mrf.mxu3 }
 0x245   : > { %v1514_v3 = vadd.f32 %v1513_v63, %v1338_v45  ;;  %1384 = vmatmul.f32.gmra.mxu1 %v306_v28  ;;  %v1167_v42 = vpop.f32.mrf.mxu0  ;;  %v2663_v39 = vadd.f32 %v1421_v14, %v1246_v47 }
 0x246   : > { %v1168_v37 = vadd.f32 %v1167_v42, %v2414_v27 }
 0x247   : > { %v1626_v23 = vmax.f32 %v1514_v3, 0.0 }
 0x249   : > { %1679 = vst.msk [vmem:[%s2465_s25 + $0xb8] sm:$0xff] %vm403_vm0, %v1626_v23 }
 0x24a   : > { %v1340_v43 = vpop.f32.mrf.mxu1 }
 0x24b   : > { %v1341_v40 = vadd.f32 %v1340_v43, %v1165_v41 }
 0x24c   : > { %v1525_v2 = vpop.f32.mrf.mxu2  ;;  %v1424_v13 = vpop.f32.mrf.mxu3 }
 0x24d   : > { %v1517_v20 = vadd.f32 %v1516_v56, %v1341_v40  ;;  %v1170_v63 = vpop.f32.mrf.mxu0  ;;  %v2669_v24 = vadd.f32 %v1424_v13, %v1249_v21 }
 0x24e   : > { %v1171_v44 = vadd.f32 %v1170_v63, %v2521_v29 }
 0x24f   : > { %v1627_v53 = vmax.f32 %v1517_v20, 0.0 }
 0x251   : > { %1680 = vst.msk [vmem:[%s2465_s25 + $0xc0] sm:$0xff] %vm403_vm0, %v1627_v53 }
 0x252   : > { %v1343_v12 = vpop.f32.mrf.mxu1 }
 0x253   : > { %v1344_v10 = vadd.f32 %v1343_v12, %v1168_v37 }
 0x254   : > { %v1528_v8 = vpop.f32.mrf.mxu2  ;;  %v1567_v49 = vpop.f32.mrf.mxu3 }
 0x255   : > { %v1520_v62 = vadd.f32 %v1519_v26, %v1344_v10  ;;  %v1173_v1 = vpop.f32.mrf.mxu0  ;;  %v1568_v54 = vadd.f32 %v1567_v49, %v2588_v48 }
 0x256   : > { %v1174_v28 = vadd.f32 %v1173_v1, %v2529_v57 }
 0x257   : > { %v1628_v56 = vmax.f32 %v1520_v62, 0.0  ;;  %v1644_v4 = vmax.f32 %v1568_v54, 0.0 }
 0x259   : > { %1681 = vst.msk [vmem:[%s2465_s25 + $0xc8] sm:$0xff] %vm403_vm0, %v1628_v56 }
 0x25a   : > { %1697 = vst.msk [vmem:[%s2465_s25 + $0x148] sm:$0xff] %vm403_vm0, %v1644_v4  ;;  %v1346_v27 = vpop.f32.mrf.mxu1 }
 0x25b   : > { %v1347_v59 = vadd.f32 %v1346_v27, %v1171_v44 }
 0x25c   : > { %v1531_v22 = vpop.f32.mrf.mxu2  ;;  %v1570_v15 = vpop.f32.mrf.mxu3 }
 0x25d   : > { %v1523_v19 = vadd.f32 %v1522_v16, %v1347_v59  ;;  %v1176_v26 = vpop.f32.mrf.mxu0  ;;  %v1571_v9 = vadd.f32 %v1570_v15, %v2596_v58 }
 0x25e   : > { %v1177_v60 = vadd.f32 %v1176_v26, %v2420_v32 }
 0x25f   : > { %v1629_v48 = vmax.f32 %v1523_v19, 0.0  ;;  %v1645_v46 = vmax.f32 %v1571_v9, 0.0 }
 0x261   : > { %1682 = vst.msk [vmem:[%s2465_s25 + $0xd0] sm:$0xff] %vm403_vm0, %v1629_v48 }
 0x262   : > { %1698 = vst.msk [vmem:[%s2465_s25 + $0x150] sm:$0xff] %vm403_vm0, %v1645_v46  ;;  %v1349_v29 = vpop.f32.mrf.mxu1 }
 0x263   : > { %v1350_v45 = vadd.f32 %v1349_v29, %v1174_v28 }
 0x264   : > { %v1534_v47 = vpop.f32.mrf.mxu2  ;;  %v1573_v14 = vpop.f32.mrf.mxu3 }
 0x265   : > { %v1526_v3 = vadd.f32 %v1525_v2, %v1350_v45  ;;  %v1179_v16 = vpop.f32.mrf.mxu0  ;;  %v1574_v42 = vadd.f32 %v1573_v14, %v2604_v18 }
 0x266   : > { %v1180_v63 = vadd.f32 %v1179_v16, %v2532_v52 }
 0x267   : > { %v1630_v58 = vmax.f32 %v1526_v3, 0.0  ;;  %v1646_v23 = vmax.f32 %v1574_v42, 0.0 }
 0x269   : > { %1683 = vst.msk [vmem:[%s2465_s25 + $0xd8] sm:$0xff] %vm403_vm0, %v1630_v58 }
 0x26a   : > { %1699 = vst.msk [vmem:[%s2465_s25 + $0x158] sm:$0xff] %vm403_vm0, %v1646_v23  ;;  %v1352_v57 = vpop.f32.mrf.mxu1 }
 0x26b   : > { %v1353_v41 = vadd.f32 %v1352_v57, %v1177_v60 }
 0x26c   : > { %v1537_v43 = vpop.f32.mrf.mxu2  ;;  %v1576_v21 = vpop.f32.mrf.mxu3 }
 0x26d   : > { %v1529_v40 = vadd.f32 %v1528_v8, %v1353_v41  ;;  %v1182_v2 = vpop.f32.mrf.mxu0  ;;  %v1577_v20 = vadd.f32 %v1576_v21, %v2612_v11 }
 0x26e   : > { %v1183_v1 = vadd.f32 %v1182_v2, %v2540_v0 }
 0x26f   : > { %v1631_v18 = vmax.f32 %v1529_v40, 0.0  ;;  %v1647_v13 = vmax.f32 %v1577_v20, 0.0 }
 0x271   : > { %1684 = vst.msk [vmem:[%s2465_s25 + $0xe0] sm:$0xff] %vm403_vm0, %v1631_v18 }
 0x272   : > { %1700 = vst.msk [vmem:[%s2465_s25 + $0x160] sm:$0xff] %vm403_vm0, %v1647_v13  ;;  %v1355_v32 = vpop.f32.mrf.mxu1 }
 0x273   : > { %v1356_v53 = vadd.f32 %v1355_v32, %v1180_v63 }
 0x274   : > { %v1540_v37 = vpop.f32.mrf.mxu2  ;;  %v1579_v10 = vpop.f32.mrf.mxu3 }
 0x275   : > { %v1532_v12 = vadd.f32 %v1531_v22, %v1356_v53  ;;  %v1185_v8 = vpop.f32.mrf.mxu0  ;;  %v1580_v62 = vadd.f32 %v1579_v10, %v2620_v25 }
 0x276   : > { %v1186_v19 = vadd.f32 %v1185_v8, %v2426_v36 }
 0x277   : > { %v1632_v11 = vmax.f32 %v1532_v12, 0.0  ;;  %v1648_v49 = vmax.f32 %v1580_v62, 0.0 }
 0x279   : > { %1685 = vst.msk [vmem:[%s2465_s25 + $0xe8] sm:$0xff] %vm403_vm0, %v1632_v11 }
 0x27a   : > { %1701 = vst.msk [vmem:[%s2465_s25 + $0x168] sm:$0xff] %vm403_vm0, %v1648_v49  ;;  %v1358_v52 = vpop.f32.mrf.mxu1 }
 0x27b   : > { %v1359_v54 = vadd.f32 %v1358_v52, %v1183_v1 }
 0x27c   : > { %v1543_v56 = vpop.f32.mrf.mxu2  ;;  %v1582_v44 = vpop.f32.mrf.mxu3 }
 0x27d   : > { %v1535_v4 = vadd.f32 %v1534_v47, %v1359_v54  ;;  %v1188_v27 = vpop.f32.mrf.mxu0  ;;  %v1583_v59 = vadd.f32 %v1582_v44, %v2628_v33 }
 0x27e   : > { %v1189_v45 = vadd.f32 %v1188_v27, %v2545_v5 }
 0x27f   : > { %v1633_v25 = vmax.f32 %v1535_v4, 0.0  ;;  %v1649_v22 = vmax.f32 %v1583_v59, 0.0 }
 0x281   : > { %1686 = vst.msk [vmem:[%s2465_s25 + $0xf0] sm:$0xff] %vm403_vm0, %v1633_v25 }
 0x282   : > { %1702 = vst.msk [vmem:[%s2465_s25 + $0x170] sm:$0xff] %vm403_vm0, %v1649_v22  ;;  %v1361_v0 = vpop.f32.mrf.mxu1 }
 0x283   : > { %v1362_v15 = vadd.f32 %v1361_v0, %v1186_v19 }
 0x284   : > { %v1546_v26 = vpop.f32.mrf.mxu2  ;;  %v1585_v48 = vpop.f32.mrf.mxu3 }
 0x285   : > { %v1538_v9 = vadd.f32 %v1537_v43, %v1362_v15  ;;  %v1191_v46 = vpop.f32.mrf.mxu0  ;;  %v1586_v28 = vadd.f32 %v1585_v48, %v2636_v35 }
 0x286   : > { %v1192_v60 = vadd.f32 %v1191_v46, %v2554_v51 }
 0x287   : > { %v1634_v33 = vmax.f32 %v1538_v9, 0.0  ;;  %v1650_v29 = vmax.f32 %v1586_v28, 0.0 }
 0x289   : > { %1687 = vst.msk [vmem:[%s2465_s25 + $0xf8] sm:$0xff] %vm403_vm0, %v1634_v33 }
 0x28a   : > { %1703 = vst.msk [vmem:[%s2465_s25 + $0x178] sm:$0xff] %vm403_vm0, %v1650_v29  ;;  %v1364_v36 = vpop.f32.mrf.mxu1 }
 0x28b   : > { %v1365_v47 = vadd.f32 %v1364_v36, %v1189_v45 }
 0x28c   : > { %v1549_v3 = vpop.f32.mrf.mxu2  ;;  %v1588_v16 = vpop.f32.mrf.mxu3 }
 0x28d   : > { %v1541_v14 = vadd.f32 %v1540_v37, %v1365_v47  ;;  %v1194_v42 = vpop.f32.mrf.mxu0  ;;  %v1589_v58 = vadd.f32 %v1588_v16, %v2644_v31 }
 0x28e   : > { %v1195_v18 = vadd.f32 %v1194_v42, %v2434_v50 }
 0x28f   : > { %v1635_v35 = vmax.f32 %v1541_v14, 0.0  ;;  %v1651_v23 = vmax.f32 %v1589_v58, 0.0 }
 0x291   : > { %1688 = vst.msk [vmem:[%s2465_s25 + $0x100] sm:$0xff] %vm403_vm0, %v1635_v35 }
 0x292   : > { %1704 = vst.msk [vmem:[%s2465_s25 + $0x180] sm:$0xff] %vm403_vm0, %v1651_v23  ;;  %v1367_v5 = vpop.f32.mrf.mxu1 }
 0x293   : > { %v1368_v57 = vadd.f32 %v1367_v5, %v1192_v60 }
 0x294   : > { %v1552_v41 = vpop.f32.mrf.mxu2  ;;  %v1591_v40 = vpop.f32.mrf.mxu3 }
 0x295   : > { %v1544_v43 = vadd.f32 %v1543_v56, %v1368_v57  ;;  %v1592_v21 = vadd.f32 %v1591_v40, %v2651_v55  ;;  %v1197_v2 = vpop.f32.mrf.mxu0 }
 0x296   : > { %v1198_v8 = vadd.f32 %v1197_v2, %v2557_v17 }
 0x297   : > { %v1636_v31 = vmax.f32 %v1544_v43, 0.0  ;;  %v1652_v20 = vmax.f32 %v1592_v21, 0.0 }
 0x299   : > { %1689 = vst.msk [vmem:[%s2465_s25 + $0x108] sm:$0xff] %vm403_vm0, %v1636_v31 }
 0x29a   : > { %1705 = vst.msk [vmem:[%s2465_s25 + $0x188] sm:$0xff] %vm403_vm0, %v1652_v20  ;;  %v1370_v51 = vpop.f32.mrf.mxu1 }
 0x29b   : > { %v1371_v13 = vadd.f32 %v1370_v51, %v1195_v18 }
 0x29c   : > { %v1555_v63 = vpop.f32.mrf.mxu2  ;;  %v1594_v53 = vpop.f32.mrf.mxu3 }
 0x29d   : > { %v1547_v32 = vadd.f32 %v1546_v26, %v1371_v13  ;;  %v1595_v37 = vadd.f32 %v1594_v53, %v2657_v30  ;;  %v1200_v10 = vpop.f32.mrf.mxu0 }
 0x29e   : > { %v1201_v56 = vadd.f32 %v1200_v10, %v2566_v61 }
 0x29f   : > { %v1637_v55 = vmax.f32 %v1547_v32, 0.0  ;;  %v1653_v12 = vmax.f32 %v1595_v37, 0.0 }
 0x2a1   : > { %1690 = vst.msk [vmem:[%s2465_s25 + $0x110] sm:$0xff] %vm403_vm0, %v1637_v55 }
 0x2a2   : > { %1706 = vst.msk [vmem:[%s2465_s25 + $0x190] sm:$0xff] %vm403_vm0, %v1653_v12  ;;  %v1373_v50 = vpop.f32.mrf.mxu1 }
 0x2a3   : > { %v1374_v62 = vadd.f32 %v1373_v50, %v1198_v8 }
 0x2a4   : > { %v1558_v11 = vpop.f32.mrf.mxu2  ;;  %v1597_v1 = vpop.f32.mrf.mxu3 }
 0x2a5   : > { %v1550_v49 = vadd.f32 %v1549_v3, %v1374_v62  ;;  %v1598_v52 = vadd.f32 %v1597_v1, %v2663_v39  ;;  %v1203_v17 = vpop.f32.mrf.mxu0 }
 0x2a6   : > { %v1204_v0 = vadd.f32 %v1203_v17, %v2441_v38 }
 0x2a7   : > { %v1638_v30 = vmax.f32 %v1550_v49, 0.0  ;;  %v1654_v54 = vmax.f32 %v1598_v52, 0.0 }
 0x2a9   : > { %1691 = vst.msk [vmem:[%s2465_s25 + $0x118] sm:$0xff] %vm403_vm0, %v1638_v30 }
 0x2aa   : > { %1707 = vst.msk [vmem:[%s2465_s25 + $0x198] sm:$0xff] %vm403_vm0, %v1654_v54  ;;  %v1376_v4 = vpop.f32.mrf.mxu1 }
 0x2ab   : > { %v1377_v44 = vadd.f32 %v1376_v4, %v1201_v56 }
 0x2ac   : > { %v1561_v27 = vpop.f32.mrf.mxu2  ;;  %v1600_v25 = vpop.f32.mrf.mxu3 }
 0x2ad   : > { %v1553_v59 = vadd.f32 %v1552_v41, %v1377_v44  ;;  %v1601_v22 = vadd.f32 %v1600_v25, %v2669_v24  ;;  %v1206_v26 = vpop.f32.mrf.mxu0 }
 0x2ae   : > { %v1207_v33 = vadd.f32 %v1206_v26, %v2570_v34 }
 0x2af   : > { %v1639_v39 = vmax.f32 %v1553_v59, 0.0  ;;  %v1655_v19 = vmax.f32 %v1601_v22, 0.0 }
 0x2b1   : > { %1692 = vst.msk [vmem:[%s2465_s25 + $0x120] sm:$0xff] %vm403_vm0, %v1639_v39 }
 0x2b2   : > { %1708 = vst.msk [vmem:[%s2465_s25 + $0x1a0] sm:$0xf] %vm406_vm1, %v1655_v19  ;;  %v1379_v61 = vpop.f32.mrf.mxu1 }
 0x2b3   : > { %v1380_v15 = vadd.f32 %v1379_v61, %v1204_v0 }
 0x2b4   : > { %v1564_v9 = vpop.f32.mrf.mxu2 }
 0x2b5   : > { %v1556_v48 = vadd.f32 %v1555_v63, %v1380_v15  ;;  %v1565_v46 = vadd.f32 %v1564_v9, %v2578_v7  ;;  %v1209_v36 = vpop.f32.mrf.mxu0 }
 0x2b6   : > { %v1210_v3 = vadd.f32 %v1209_v36, %v2580_v6 }
 0x2b7   : > { %v1640_v28 = vmax.f32 %v1556_v48, 0.0  ;;  %v1643_v24 = vmax.f32 %v1565_v46, 0.0 }
 0x2b9   : > { %1693 = vst.msk [vmem:[%s2465_s25 + $0x128] sm:$0xff] %vm403_vm0, %v1640_v28 }
 0x2ba   : > { %1696 = vst.msk [vmem:[%s2465_s25 + $0x140] sm:$0xff] %vm403_vm0, %v1643_v24  ;;  %v1382_v38 = vpop.f32.mrf.mxu1 }
 0x2bb   : > { %v1383_v29 = vadd.f32 %v1382_v38, %v1207_v33 }
 0x2bd   : > { %v1559_v45 = vadd.f32 %v1558_v11, %v1383_v29 }
 0x2bf   : > { %v1641_v47 = vmax.f32 %v1559_v45, 0.0 }
 0x2c1   : > { %1694 = vst.msk [vmem:[%s2465_s25 + $0x130] sm:$0xff] %vm403_vm0, %v1641_v47 }
 0x2c2   : > { %v1385_v14 = vpop.f32.mrf.mxu1 }
 0x2c3   : > { %v1386_v7 = vadd.f32 %v1385_v14, %v1210_v3 }
 0x2c5   : > { %v1562_v16 = vadd.f32 %v1561_v27, %v1386_v7 }
 0x2c7   : > { %v1642_v42 = vmax.f32 %v1562_v16, 0.0 }
 0x2c9   : > { %1695 = vst.msk [vmem:[%s2465_s25 + $0x138] sm:$0xff] %vm403_vm0, %v1642_v42 }
 0x2ca PF: > { %s14_s12 = sadd.s32 1, %s1967_s12  }
 0x2cb   : > { %p11_p7 = scmp.ge.s32.totalorder %s14_s12, 4  }
 0x2cd   :  { %13 = sbr.rel (!%p11_p7) target bundleno = 1 (0x1), region = 67 }
 0x2d2   :  { %1730 = vsyncpa [#allocation4], 1 }
 0x2d3   :  { %1732 = vsyncpa [#allocation4 + $0x1], 1 }

</bundles_post_ra>
